<compile_context>
chip_gen: v5e
topology: v5e:2x2
jax: 0.10.0
libtpu: 0.0.40
codegen_flags: <defaults>
</compile_context>

<pallas_src>
import jax
import jax.numpy as jnp
from jax.experimental import pallas as pl
from jax.experimental.pallas import tpu as pltpu


def _make_kernel(B_TILE, H, W, C_in, C_mid_pad):
    HW = H * W

    def kernel(x_ref, w1_ref, b1_ref, o_ref):
        # x_ref : (B_TILE, H+2, W+2, C_in)   zero-padded NHWC images
        # w1_ref: (9, C_in, C_mid_pad)       3x3 conv weight, one slice per tap
        # b1_ref: (1, C_mid_pad)
        # o_ref : (1, B_TILE, C_mid_pad)     pooled SUM of relu(conv + b1)
        w1 = w1_ref[...]                     # hoisted weight/bias loads
        b1 = b1_ref[...]

        rows = []
        for b in range(B_TILE):              # static unroll (B_TILE is small)
            xb = x_ref[b]                    # (H+2, W+2, C_in)
            acc = None
            # 3x3 SAME conv as 9 accumulating MXU matmuls over shifted windows
            # built in VMEM (no im2col buffer anywhere).
            for ky in range(3):
                for kx in range(3):
                    win = xb[ky:ky + H, kx:kx + W, :].reshape(HW, C_in)
                    contrib = jnp.dot(win, w1[ky * 3 + kx],
                                      preferred_element_type=jnp.float32)
                    acc = contrib if acc is None else acc + contrib
            act = jnp.maximum(acc + b1, 0.0)                 # bias + ReLU
            rows.append(jnp.sum(act, axis=0, keepdims=True))  # (1, C_mid_pad)

        # One batched, lane-dense writeback per grid step.
        o_ref[0] = jnp.concatenate(rows, axis=0)

    return kernel


def _pick_batch_tile(N, Hp, Wp, C_in, vmem_budget_bytes=8 * 1024 * 1024):
    """Largest batch tile whose double-buffered input block fits the budget,
    capped so the grid keeps >= 2 steps when N >= 2 (v7x has 2 TCs)."""
    per_elem = Hp * Wp * C_in * 4          # f32 bytes per padded batch element
    max_fit = max(1, vmem_budget_bytes // (2 * per_elem))
    cap = max(1, N // 2) if N >= 2 else 1
    bt = max(1, min(int(max_fit), cap, N))
    while N % bt != 0:
        bt -= 1
    return bt


@jax.jit
def pretrained_spatial_extractor(x_nchw, w1_hwio, b1, w2_io, b2):
    """x_nchw: (N, C_in, H, W) float32 -> (N, C_out) float32."""
    N, C_in, H, W = x_nchw.shape
    C_mid = w1_hwio.shape[-1]
    C_out = w2_io.shape[-1]
    HW = H * W
    LANES = 128
    C_mid_pad = ((C_mid + LANES - 1) // LANES) * LANES
    Hp, Wp = H + 2, W + 2

    # NCHW -> NHWC + zero pad for the padding=1 conv.  This (~1.27x input
    # bytes) is the only full-resolution HBM intermediate.
    x_nhwc = jnp.transpose(x_nchw, (0, 2, 3, 1))
    x_pad = jnp.pad(x_nhwc, ((0, 0), (1, 1), (1, 1), (0, 0)))

    # (3,3,C_in,C_mid) -> (9, C_in, C_mid_pad); lane-pad so the conv matmul N
    # dim and the kernel output store are 128-lane dense (padded lanes stay 0).
    w1_flat = jnp.zeros((9, C_in, C_mid_pad), jnp.float32)
    w1_flat = w1_flat.at[:, :, :C_mid].set(w1_hwio.reshape(9, C_in, C_mid))
    b1_pad = jnp.zeros((1, C_mid_pad), jnp.float32).at[:, :C_mid].set(
        b1.reshape(1, C_mid))

    B_TILE = _pick_batch_tile(N, Hp, Wp, C_in)
    steps = N // B_TILE

    kernel = _make_kernel(B_TILE, H, W, C_in, C_mid_pad)

    pooled_sum = pl.pallas_call(
        kernel,
        out_shape=jax.ShapeDtypeStruct((steps, B_TILE, C_mid_pad), jnp.float32),
        grid_spec=pltpu.PrefetchScalarGridSpec(
            num_scalar_prefetch=0,
            grid=(steps,),
            in_specs=[
                pl.BlockSpec((B_TILE, Hp, Wp, C_in), lambda n: (n, 0, 0, 0)),
                pl.BlockSpec((9, C_in, C_mid_pad), lambda n: (0, 0, 0)),
                pl.BlockSpec((1, C_mid_pad), lambda n: (0, 0)),
            ],
            out_specs=pl.BlockSpec((1, B_TILE, C_mid_pad),
                                   lambda n: (n, 0, 0)),
        ),
        compiler_params=pltpu.CompilerParams(
            dimension_semantics=("parallel",),
            vmem_limit_bytes=32 * 1024 * 1024),
    )(x_pad, w1_flat, b1_pad)

    # Adapter hoisted out of the kernel: exact because it is a pure linear
    # 1x1 conv + bias, so mean(f @ w2 + b2) == mean(f) @ w2 + b2.  The 1/HW
    # mean scale is folded into w2.
    pooled_sum = pooled_sum.reshape(N, C_mid_pad)[:, :C_mid]     # (N, C_mid)
    return pooled_sum @ (w2_io * (1.0 / HW)) + b2.reshape(1, C_out)


def _reference(x_nchw, w1_hwio, b1, w2_io, b2):
    """Pure-JAX reference mirroring the PyTorch forward semantics."""
    x_nhwc = jnp.transpose(x_nchw, (0, 2, 3, 1))
    feat = jax.lax.conv_general_dilated(
        x_nhwc, w1_hwio, window_strides=(1, 1), padding="SAME",
        dimension_numbers=("NHWC", "HWIO", "NHWC"))
    feat = jax.nn.relu(feat + b1)
    feat = jnp.einsum("nhwc,cd->nhwd", feat, w2_io) + b2
    return jnp.mean(feat, axis=(1, 2))  # mean over spatial dims


if __name__ == "__main__":
    N, C_in, H, W = 2, 4, 16, 16
    C_mid, C_out = 32, 32

    key = jax.random.PRNGKey(0)
    kx, kw1, kb1, kw2, kb2 = jax.random.split(key, 5)

    x = jax.random.normal(kx, (N, C_in, H, W), dtype=jnp.float32)
    # Deterministic synthetic parameters (no checkpoint loading).
    w1 = jax.random.normal(kw1, (3, 3, C_in, C_mid), dtype=jnp.float32) * 0.1
    b1 = jax.random.normal(kb1, (C_mid,), dtype=jnp.float32) * 0.1
    w2 = jax.random.normal(kw2, (C_mid, C_out), dtype=jnp.float32) * 0.1
    b2 = jax.random.normal(kb2, (C_out,), dtype=jnp.float32) * 0.1

    out = jax.block_until_ready(pretrained_spatial_extractor(x, w1, b1, w2, b2))
    ref = jax.block_until_ready(_reference(x, w1, b1, w2, b2))

    assert out.shape == (N, C_out), out.shape
    assert jnp.allclose(out, ref, rtol=1e-4, atol=1e-4), \
        f"max abs err {jnp.max(jnp.abs(out - ref))}"

    print("KERNEL_OK")
</pallas_src>

<mosaic_0001>
module attributes {stable_mosaic.version = 11 : i64} {
  func.func @kernel(%arg0: i32, %arg1: memref<1x18x18x4xf32, #tpu.memory_space<vmem>>, %arg2: memref<9x4x128xf32, #tpu.memory_space<vmem>>, %arg3: memref<1x128xf32, #tpu.memory_space<vmem>>, %arg4: memref<1x1x128xf32, #tpu.memory_space<vmem>>) attributes {dimension_semantics = [#tpu.dimension_semantics<parallel>], iteration_bounds = array<i64: 2>, scalar_prefetch = 0 : i64, scratch_operands = 0 : i64, tpu.core_type = #tpu.core_type<tc>, window_params = [{transform_indices = @transform_0, window_bounds = array<i64: 1, 18, 18, 4>}, {pipeline_mode = #tpu.pipeline_mode<synchronous>, transform_indices = @transform_1, window_bounds = array<i64: 9, 4, 128>}, {pipeline_mode = #tpu.pipeline_mode<synchronous>, transform_indices = @transform_2, window_bounds = array<i64: 1, 128>}, {transform_indices = @transform_3, window_bounds = array<i64: 1, 1, 128>}]} {
    %c0 = arith.constant 0 : index
    %c0_0 = arith.constant 0 : index
    %c0_1 = arith.constant 0 : index
    %0 = vector.load %arg2[%c0, %c0_0, %c0_1] : memref<9x4x128xf32, #tpu.memory_space<vmem>>, vector<9x4x128xf32>
    %c0_2 = arith.constant 0 : index
    %c0_3 = arith.constant 0 : index
    %1 = vector.load %arg3[%c0_2, %c0_3] : memref<1x128xf32, #tpu.memory_space<vmem>>, vector<1x128xf32>
    %c0_4 = arith.constant 0 : index
    %c0_5 = arith.constant 0 : index
    %c0_6 = arith.constant 0 : index
    %c0_7 = arith.constant 0 : index
    %2 = vector.load %arg1[%c0_4, %c0_5, %c0_6, %c0_7] : memref<1x18x18x4xf32, #tpu.memory_space<vmem>>, vector<1x18x18x4xf32>
    %3 = vector.shape_cast %2 : vector<1x18x18x4xf32> to vector<18x18x4xf32>
    %4 = vector.extract_strided_slice %3 {offsets = [0, 0, 0], sizes = [16, 16, 4], strides = [1, 1, 1]} : vector<18x18x4xf32> to vector<16x16x4xf32>
    %5 = vector.shape_cast %4 : vector<16x16x4xf32> to vector<256x4xf32>
    %6 = vector.extract_strided_slice %0 {offsets = [0, 0, 0], sizes = [1, 4, 128], strides = [1, 1, 1]} : vector<9x4x128xf32> to vector<1x4x128xf32>
    %7 = vector.shape_cast %6 : vector<1x4x128xf32> to vector<4x128xf32>
    %cst = arith.constant dense<0.000000e+00> : vector<256x128xf32>
    %8 = tpu.matmul %5, %7, %cst {dimension_numbers = #tpu.dot_dimension_numbers<[1], [0], [0], [1], [0, 0, 1, 1], [], []>} : vector<256x4xf32>, vector<4x128xf32>, vector<256x128xf32> -> vector<256x128xf32>
    %9 = vector.extract_strided_slice %3 {offsets = [0, 1, 0], sizes = [16, 16, 4], strides = [1, 1, 1]} : vector<18x18x4xf32> to vector<16x16x4xf32>
    %10 = vector.shape_cast %9 : vector<16x16x4xf32> to vector<256x4xf32>
    %11 = vector.extract_strided_slice %0 {offsets = [1, 0, 0], sizes = [1, 4, 128], strides = [1, 1, 1]} : vector<9x4x128xf32> to vector<1x4x128xf32>
    %12 = vector.shape_cast %11 : vector<1x4x128xf32> to vector<4x128xf32>
    %cst_8 = arith.constant dense<0.000000e+00> : vector<256x128xf32>
    %13 = tpu.matmul %10, %12, %cst_8 {dimension_numbers = #tpu.dot_dimension_numbers<[1], [0], [0], [1], [0, 0, 1, 1], [], []>} : vector<256x4xf32>, vector<4x128xf32>, vector<256x128xf32> -> vector<256x128xf32>
    %14 = arith.addf %8, %13 : vector<256x128xf32>
    %15 = vector.extract_strided_slice %3 {offsets = [0, 2, 0], sizes = [16, 16, 4], strides = [1, 1, 1]} : vector<18x18x4xf32> to vector<16x16x4xf32>
    %16 = vector.shape_cast %15 : vector<16x16x4xf32> to vector<256x4xf32>
    %17 = vector.extract_strided_slice %0 {offsets = [2, 0, 0], sizes = [1, 4, 128], strides = [1, 1, 1]} : vector<9x4x128xf32> to vector<1x4x128xf32>
    %18 = vector.shape_cast %17 : vector<1x4x128xf32> to vector<4x128xf32>
    %cst_9 = arith.constant dense<0.000000e+00> : vector<256x128xf32>
    %19 = tpu.matmul %16, %18, %cst_9 {dimension_numbers = #tpu.dot_dimension_numbers<[1], [0], [0], [1], [0, 0, 1, 1], [], []>} : vector<256x4xf32>, vector<4x128xf32>, vector<256x128xf32> -> vector<256x128xf32>
    %20 = arith.addf %14, %19 : vector<256x128xf32>
    %21 = vector.extract_strided_slice %3 {offsets = [1, 0, 0], sizes = [16, 16, 4], strides = [1, 1, 1]} : vector<18x18x4xf32> to vector<16x16x4xf32>
    %22 = vector.shape_cast %21 : vector<16x16x4xf32> to vector<256x4xf32>
    %23 = vector.extract_strided_slice %0 {offsets = [3, 0, 0], sizes = [1, 4, 128], strides = [1, 1, 1]} : vector<9x4x128xf32> to vector<1x4x128xf32>
    %24 = vector.shape_cast %23 : vector<1x4x128xf32> to vector<4x128xf32>
    %cst_10 = arith.constant dense<0.000000e+00> : vector<256x128xf32>
    %25 = tpu.matmul %22, %24, %cst_10 {dimension_numbers = #tpu.dot_dimension_numbers<[1], [0], [0], [1], [0, 0, 1, 1], [], []>} : vector<256x4xf32>, vector<4x128xf32>, vector<256x128xf32> -> vector<256x128xf32>
    %26 = arith.addf %20, %25 : vector<256x128xf32>
    %27 = vector.extract_strided_slice %3 {offsets = [1, 1, 0], sizes = [16, 16, 4], strides = [1, 1, 1]} : vector<18x18x4xf32> to vector<16x16x4xf32>
    %28 = vector.shape_cast %27 : vector<16x16x4xf32> to vector<256x4xf32>
    %29 = vector.extract_strided_slice %0 {offsets = [4, 0, 0], sizes = [1, 4, 128], strides = [1, 1, 1]} : vector<9x4x128xf32> to vector<1x4x128xf32>
    %30 = vector.shape_cast %29 : vector<1x4x128xf32> to vector<4x128xf32>
    %cst_11 = arith.constant dense<0.000000e+00> : vector<256x128xf32>
    %31 = tpu.matmul %28, %30, %cst_11 {dimension_numbers = #tpu.dot_dimension_numbers<[1], [0], [0], [1], [0, 0, 1, 1], [], []>} : vector<256x4xf32>, vector<4x128xf32>, vector<256x128xf32> -> vector<256x128xf32>
    %32 = arith.addf %26, %31 : vector<256x128xf32>
    %33 = vector.extract_strided_slice %3 {offsets = [1, 2, 0], sizes = [16, 16, 4], strides = [1, 1, 1]} : vector<18x18x4xf32> to vector<16x16x4xf32>
    %34 = vector.shape_cast %33 : vector<16x16x4xf32> to vector<256x4xf32>
    %35 = vector.extract_strided_slice %0 {offsets = [5, 0, 0], sizes = [1, 4, 128], strides = [1, 1, 1]} : vector<9x4x128xf32> to vector<1x4x128xf32>
    %36 = vector.shape_cast %35 : vector<1x4x128xf32> to vector<4x128xf32>
    %cst_12 = arith.constant dense<0.000000e+00> : vector<256x128xf32>
    %37 = tpu.matmul %34, %36, %cst_12 {dimension_numbers = #tpu.dot_dimension_numbers<[1], [0], [0], [1], [0, 0, 1, 1], [], []>} : vector<256x4xf32>, vector<4x128xf32>, vector<256x128xf32> -> vector<256x128xf32>
    %38 = arith.addf %32, %37 : vector<256x128xf32>
    %39 = vector.extract_strided_slice %3 {offsets = [2, 0, 0], sizes = [16, 16, 4], strides = [1, 1, 1]} : vector<18x18x4xf32> to vector<16x16x4xf32>
    %40 = vector.shape_cast %39 : vector<16x16x4xf32> to vector<256x4xf32>
    %41 = vector.extract_strided_slice %0 {offsets = [6, 0, 0], sizes = [1, 4, 128], strides = [1, 1, 1]} : vector<9x4x128xf32> to vector<1x4x128xf32>
    %42 = vector.shape_cast %41 : vector<1x4x128xf32> to vector<4x128xf32>
    %cst_13 = arith.constant dense<0.000000e+00> : vector<256x128xf32>
    %43 = tpu.matmul %40, %42, %cst_13 {dimension_numbers = #tpu.dot_dimension_numbers<[1], [0], [0], [1], [0, 0, 1, 1], [], []>} : vector<256x4xf32>, vector<4x128xf32>, vector<256x128xf32> -> vector<256x128xf32>
    %44 = arith.addf %38, %43 : vector<256x128xf32>
    %45 = vector.extract_strided_slice %3 {offsets = [2, 1, 0], sizes = [16, 16, 4], strides = [1, 1, 1]} : vector<18x18x4xf32> to vector<16x16x4xf32>
    %46 = vector.shape_cast %45 : vector<16x16x4xf32> to vector<256x4xf32>
    %47 = vector.extract_strided_slice %0 {offsets = [7, 0, 0], sizes = [1, 4, 128], strides = [1, 1, 1]} : vector<9x4x128xf32> to vector<1x4x128xf32>
    %48 = vector.shape_cast %47 : vector<1x4x128xf32> to vector<4x128xf32>
    %cst_14 = arith.constant dense<0.000000e+00> : vector<256x128xf32>
    %49 = tpu.matmul %46, %48, %cst_14 {dimension_numbers = #tpu.dot_dimension_numbers<[1], [0], [0], [1], [0, 0, 1, 1], [], []>} : vector<256x4xf32>, vector<4x128xf32>, vector<256x128xf32> -> vector<256x128xf32>
    %50 = arith.addf %44, %49 : vector<256x128xf32>
    %51 = vector.extract_strided_slice %3 {offsets = [2, 2, 0], sizes = [16, 16, 4], strides = [1, 1, 1]} : vector<18x18x4xf32> to vector<16x16x4xf32>
    %52 = vector.shape_cast %51 : vector<16x16x4xf32> to vector<256x4xf32>
    %53 = vector.extract_strided_slice %0 {offsets = [8, 0, 0], sizes = [1, 4, 128], strides = [1, 1, 1]} : vector<9x4x128xf32> to vector<1x4x128xf32>
    %54 = vector.shape_cast %53 : vector<1x4x128xf32> to vector<4x128xf32>
    %cst_15 = arith.constant dense<0.000000e+00> : vector<256x128xf32>
    %55 = tpu.matmul %52, %54, %cst_15 {dimension_numbers = #tpu.dot_dimension_numbers<[1], [0], [0], [1], [0, 0, 1, 1], [], []>} : vector<256x4xf32>, vector<4x128xf32>, vector<256x128xf32> -> vector<256x128xf32>
    %56 = arith.addf %50, %55 : vector<256x128xf32>
    %57 = vector.broadcast %1 : vector<1x128xf32> to vector<256x128xf32>
    %58 = arith.addf %56, %57 : vector<256x128xf32>
    %cst_16 = arith.constant 0.000000e+00 : f32
    %59 = vector.broadcast %cst_16 : f32 to vector<256x128xf32>
    %60 = arith.maximumf %58, %59 : vector<256x128xf32>
    %cst_17 = arith.constant dense<0.000000e+00> : vector<128xf32>
    %61 = vector.multi_reduction <add>, %60, %cst_17 [0] : vector<256x128xf32> to vector<128xf32>
    %62 = vector.shape_cast %61 : vector<128xf32> to vector<1x128xf32>
    %c0_18 = arith.constant 0 : index
    %c0_19 = arith.constant 0 : index
    %c0_20 = arith.constant 0 : index
    %63 = vector.load %arg4[%c0_18, %c0_19, %c0_20] : memref<1x1x128xf32, #tpu.memory_space<vmem>>, vector<1x1x128xf32>
    %64 = vector.shape_cast %63 : vector<1x1x128xf32> to vector<1x128xf32>
    %65 = vector.shape_cast %62 : vector<1x128xf32> to vector<1x1x128xf32>
    tpu.vector_store %arg4[%c0_18, %c0_19, %c0_20], %65 {strides = array<i32>} : memref<1x1x128xf32, #tpu.memory_space<vmem>>, vector<1x1x128xf32>,
    return
  }
  func.func @transform_0(%arg0: i32) -> (i32, i32, i32, i32) {
    %c0_i32 = arith.constant 0 : i32
    %c0_i32_0 = arith.constant 0 : i32
    %c0_i32_1 = arith.constant 0 : i32
    %c0_i32_2 = arith.constant 0 : i32
    return %arg0, %c0_i32, %c0_i32_0, %c0_i32_1 : i32, i32, i32, i32
  }
  func.func @transform_1(%arg0: i32) -> (i32, i32, i32) {
    %c0_i32 = arith.constant 0 : i32
    %c0_i32_0 = arith.constant 0 : i32
    %c0_i32_1 = arith.constant 0 : i32
    %c0_i32_2 = arith.constant 0 : i32
    return %c0_i32, %c0_i32_0, %c0_i32_1 : i32, i32, i32
  }
  func.func @transform_2(%arg0: i32) -> (i32, i32) {
    %c0_i32 = arith.constant 0 : i32
    %c0_i32_0 = arith.constant 0 : i32
    %c0_i32_1 = arith.constant 0 : i32
    return %c0_i32, %c0_i32_0 : i32, i32
  }
  func.func @transform_3(%arg0: i32) -> (i32, i32, i32) {
    %c0_i32 = arith.constant 0 : i32
    %c0_i32_0 = arith.constant 0 : i32
    %c0_i32_1 = arith.constant 0 : i32
    return %arg0, %c0_i32, %c0_i32_0 : i32, i32, i32
  }
}

</mosaic_0001>

<bundles_post_ra>
// kernel: pretrained_spatial_extractor.1
= control target key start
LH: loop header
LB: loop body
LE: loop exit
PB: predicated region body
PF: predicated region fallthrough
CT: control target
= control target key end

     0   :  { %s2475_s12 = smov 0   ;;  %s3782_s0 = inlined_call_operand.vmem [shape: f32[2,18,18,4], index: 0, kind: input, shape index: {}]   ;;  %s3783_s1 = inlined_call_operand.vmem [shape: f32[9,4,128], index: 1, kind: input, shape index: {}]   ;;  %s3784_s2 = inlined_call_operand.vmem [shape: f32[1,128], index: 2, kind: input, shape index: {}]   ;;  %s3785_s3 = inlined_call_operand.vmem [shape: f32[2,1,128], index: 3, kind: output, shape index: {}]  }
   0x1 LB: > { %s2105_s13 = sadd.s32 4294967295, %s2453_s12   ;;  %p2109_p0 = scmp.ge.s32.totalorder %s2453_s12, 1  ;;  %s2453_s12 = sphi %s2475_s12, %s13_s12  }
   0x2   : > { %p137_p1 = scmp.lt.s32.totalorder %s2453_s12, 3 }
   0x4   : > { %p138_p2 = pnand %p2109_p0, %p137_p1 }
   0x6   : > { %141 = sbr.rel (%p138_p2) target bundleno = 747 (0x2eb), region = 32 }
   0xb   : > { %v168_v0 = vld [vmem:[%s3783_s1 + $0x4] sm:$0xf]  ;;  %vm425_vm0 = vcmask 1043456   ;;  %p159_p3 = scmp.lt.s32.totalorder %s2105_s13, 1  ;;  %v169_v1 = vld [vmem:[%s3783_s1 + $0x8] sm:$0xf] }
   0xc   : > { %2410 = vmatpush.msk.msra.mxu1 %vm425_vm0, %v168_v0  ;;  %2411 = vmatpush.msk.msra.mxu2 %vm425_vm0, %v168_v0  ;;  %v170_v2 = vld [vmem:[%s3783_s1 + $0xc] sm:$0xf]  ;;  %v167_v3 = vld [vmem:[%s3783_s1] sm:$0xf]  ;;  %v171_v4 = vld [vmem:[%s3783_s1 + $0x10] sm:$0xf] }
   0xd   : > { %s4000_s13 = smov (!%p159_p3, %s2105_s13), 1  ;;  %2412 = vmatpush.msk.msra.mxu3 %vm425_vm0, %v168_v0  ;;  %2111 = vmatpush.msk.msra.mxu0 %vm425_vm0, %v168_v0  ;;  %vm279_vm1 = vcmask 1046528   ;;  %vm360_vm2 = vcmask 31744   ;;  %vm722_vm3 = vcmask 1045504  }
   0xe   : > { %2177 = vmatpush.msk.msrb.mxu2 %vm425_vm0, %v169_v1  ;;  %2144 = vmatpush.msk.msrb.mxu1 %vm425_vm0, %v167_v3  ;;  %s2413_s24 = smul.u32 432, %s4000_s13  ;;  %s166_s15 = scalar_lea.vmem %s3785_s3, %s4000_s13 }
   0xf   : > { %2210 = vmatpush.msk.msrb.mxu3 %vm425_vm0, %v170_v2  ;;  %2243 = vmatpush.msk.msrb.mxu0 %vm425_vm0, %v171_v4 }
  0x10   : > { %s2512_s27 = scalar_lea.vmem %s3782_s0, %s2413_s24 }
  0x11   : > { %v2515_v5 = vld [vmem:[%s2512_s27 + $0x60] sm:$0xff]  ;;  %v2518_v6 = vld [vmem:[%s2512_s27 + $0x68] sm:$0xff]  ;;  %v2539_v17 = vld [vmem:[%s2512_s27 + $0x70] sm:$0x3] }
  0x12   : > { %v2521_v7 = vld [vmem:[%s2512_s27 + $0xc0] sm:$0xff]  ;;  %v300_v8 = vrot.slane %v2515_v5, 1  ;;  %v301_v9 = vrot.slane %v2518_v6, 1  ;;  %v2526_v10 = vld [vmem:[%s2512_s27 + $0xc8] sm:$0xff]  ;;  %v2548_v20 = vld [vmem:[%s2512_s27 + $0xd0] sm:$0x3] }
  0x13   : > { %v320_v11 = vrot.slane %v2521_v7, 1  ;;  %v2530_v12 = vld [vmem:[%s2512_s27 + $0x120] sm:$0xff]  ;;  %v2533_v13 = vld [vmem:[%s2512_s27 + $0x128] sm:$0xff]  ;;  %v321_v14 = vrot.slane %v2526_v10, 1  ;;  %v2564_v26 = vld [vmem:[%s2512_s27 + $0x130] sm:$0x3] }
  0x14   : > { %3861 = vst [vmem:[#allocation2_spill] sm:$0xff] %v2530_v12  ;;  %v340_v15 = vrot.slane %v2530_v12, 1  ;;  %v341_v16 = vrot.slane %v2533_v13, 1  ;;  %v2542_v18 = vld [vmem:[%s2512_s27] sm:$0xff]  ;;  %v2545_v19 = vsel %vm279_vm1, %v300_v8, %v301_v9  ;;  %v2551_v21 = vld [vmem:[%s2512_s27 + $0x8] sm:$0xff]  ;;  %v303_v27 = vrot.slane %v2539_v17, 1 }
  0x15   : > { %3862 = vst [vmem:[#allocation3_spill] sm:$0xff] %v2533_v13  ;;  %v280_v22 = vrot.slane %v2542_v18, 1  ;;  %2120 = vmatmul.msk.f32.vlgmr.msra.gmra.mxu1 %vm360_vm2, %v2545_v19  ;;  %v2557_v23 = vsel %vm279_vm1, %v320_v11, %v321_v14  ;;  %v281_v25 = vrot.slane %v2551_v21, 1  ;;  %v2572_v28 = vld [vmem:[%s2512_s27 + $0x10] sm:$0x3]  ;;  %v323_v29 = vrot.slane %v2548_v20, 1 }
  0x16   : > { %3863 = vst [vmem:[#allocation4_spill] sm:$0xff] %v2557_v23  ;;  %v2560_v24 = vsel %vm279_vm1, %v340_v15, %v341_v16  ;;  %2128 = vmatmul.msk.f32.vlgmr.msra.gmra.mxu2 %vm360_vm2, %v2557_v23  ;;  %v343_v31 = vrot.slane %v2564_v26, 1  ;;  %v283_v32 = vrot.slane %v2572_v28, 1  ;;  %v2580_v33 = vsel %vm279_vm1, %v301_v9, %v303_v27  ;;  %v2589_v36 = vld [vmem:[%s2512_s27 + $0x78] sm:$0xff]  ;;  %v2592_v37 = vld [vmem:[%s2512_s27 + $0x80] sm:$0xff]  ;;  %v2674_v4 = vld [vmem:[%s2512_s27 + $0x90] sm:$0xff] }
  0x17   : > { %3864 = vst [vmem:[#allocation5_spill] sm:$0xff] %v2560_v24  ;;  %2136 = vmatmul.msk.f32.vlgmr.msra.gmra.mxu3 %vm360_vm2, %v2560_v24  ;;  %v282_v30 = vsel %vm279_vm1, %v280_v22, %v281_v25  ;;  %v2583_v34 = vsel %vm279_vm1, %v321_v14, %v323_v29  ;;  %v2595_v38 = vld [vmem:[%s2512_s27 + $0xd8] sm:$0xff]  ;;  %v2598_v39 = vld [vmem:[%s2512_s27 + $0xe0] sm:$0xff]  ;;  %v305_v43 = vrot.slane %v2589_v36, 1  ;;  %v306_v44 = vrot.slane %v2592_v37, 1  ;;  %v2680_v9 = vld [vmem:[%s2512_s27 + $0xf0] sm:$0xff] }
  0x18   : > { %3865 = vst [vmem:[#allocation6_spill] sm:$0xff] %v2564_v26  ;;  %2112 = vmatmul.msk.f32.vlgmr.msra.gmra.mxu0 %vm360_vm2, %v282_v30  ;;  %v2586_v35 = vsel %vm279_vm1, %v341_v16, %v343_v31  ;;  %v2601_v40 = vld [vmem:[%s2512_s27 + $0x138] sm:$0xff]  ;;  %v2604_v41 = vld [vmem:[%s2512_s27 + $0x140] sm:$0xff]  ;;  %v284_v42 = vsel %vm279_vm1, %v281_v25, %v283_v32  ;;  %v325_v47 = vrot.slane %v2595_v38, 1  ;;  %v326_v48 = vrot.slane %v2598_v39, 1  ;;  %v2686_v14 = vld [vmem:[%s2512_s27 + $0x150] sm:$0xff] }
  0x19   : > { %3866 = vst [vmem:[#allocation7_spill] sm:$0xff] %v2580_v33  ;;  %v2616_v45 = vld [vmem:[%s2512_s27 + $0x18] sm:$0xff]  ;;  %v2619_v46 = vld [vmem:[%s2512_s27 + $0x20] sm:$0xff]  ;;  %v345_v49 = vrot.slane %v2601_v40, 1  ;;  %v346_v50 = vrot.slane %v2604_v41, 1  ;;  %v2629_v53 = vsel %vm279_vm1, %v305_v43, %v306_v44  ;;  %v310_v22 = vrot.slane %v2674_v4, 1 }
  0x1a   : > { %3867 = vst [vmem:[#allocation8_spill] sm:$0xff] %v2583_v34  ;;  %v285_v51 = vrot.slane %v2616_v45, 1  ;;  %v286_v52 = vrot.slane %v2619_v46, 1  ;;  %v2632_v54 = vsel %vm279_vm1, %v325_v47, %v326_v48  ;;  %v2638_v56 = vld [vmem:[%s2512_s27 + $0x88] sm:$0x3]  ;;  %v2677_v8 = vld [vmem:[%s2512_s27 + $0x98] sm:$0xff] }
  0x1b   : > { %3868 = vst [vmem:[#allocation9_spill] sm:$0xff] %v2586_v35  ;;  %v2635_v55 = vsel %vm279_vm1, %v345_v49, %v346_v50  ;;  %v2641_v57 = vld [vmem:[%s2512_s27 + $0xe8] sm:$0x3]  ;;  %v308_v60 = vrot.slane %v2638_v56, 1  ;;  %v2683_v11 = vld [vmem:[%s2512_s27 + $0xf8] sm:$0xff]  ;;  %v311_v25 = vrot.slane %v2677_v8, 1 }
  0x1c   : > { %3869 = vst [vmem:[#allocation10_spill] sm:$0xff] %v2601_v40  ;;  %v2644_v58 = vld [vmem:[%s2512_s27 + $0x148] sm:$0x3]  ;;  %v2649_v59 = vsel %vm279_vm1, %v285_v51, %v286_v52  ;;  %v328_v62 = vrot.slane %v2641_v57, 1  ;;  %v2689_v15 = vld [vmem:[%s2512_s27 + $0x158] sm:$0xff]  ;;  %v2703_v27 = vld [vmem:[%s2512_s27 + $0x30] sm:$0xff] }
  0x1d   : > { %3870 = vst [vmem:[#allocation11_spill] sm:$0xff] %v2604_v41  ;;  %2121 = vmatmul.msk.f32.gmra.mxu1 %vm360_vm2, %v2580_v33  ;;  %v2657_v61 = vld [vmem:[%s2512_s27 + $0x28] sm:$0x3]  ;;  %v348_v63 = vrot.slane %v2644_v58, 1  ;;  %v2665_v1 = vsel %vm279_vm1, %v306_v44, %v308_v60  ;;  %v2706_v29 = vld [vmem:[%s2512_s27 + $0x38] sm:$0xff]  ;;  %v330_v30 = vrot.slane %v2680_v9, 1  ;;  %v2717_v47 = vsel %vm279_vm1, %v310_v22, %v311_v25 }
  0x1e   : > { %2129 = vmatmul.msk.f32.gmra.mxu2 %vm360_vm2, %v2583_v34  ;;  %3871 = vst [vmem:[#allocation12_spill] sm:$0xff] %v2629_v53  ;;  %v288_v0 = vrot.slane %v2657_v61, 1  ;;  %v2668_v2 = vsel %vm279_vm1, %v326_v48, %v328_v62  ;;  %v331_v31 = vrot.slane %v2683_v11, 1  ;;  %v350_v32 = vrot.slane %v2686_v14, 1  ;;  %v2720_v48 = vld [vmem:[%s2512_s27 + $0xa0] sm:$0x3] }
  0x1f   : > { %2137 = vmatmul.msk.f32.gmra.mxu3 %vm360_vm2, %v2586_v35  ;;  %3872 = vst [vmem:[#allocation13_spill] sm:$0xff] %v2635_v55  ;;  %v2671_v3 = vsel %vm279_vm1, %v346_v50, %v348_v63  ;;  %v290_v43 = vrot.slane %v2703_v27, 1  ;;  %v291_v44 = vrot.slane %v2706_v29, 1  ;;  %v2729_v51 = vld [vmem:[%s2512_s27 + $0x100] sm:$0x3]  ;;  %v313_v60 = vrot.slane %v2720_v48, 1 }
  0x20   : > { %2113 = vmatmul.msk.f32.gmra.mxu0 %vm360_vm2, %v284_v42  ;;  %3873 = vst [vmem:[#allocation14_spill] sm:$0xff] %v2644_v58  ;;  %v2694_v16 = vsel %vm279_vm1, %v286_v52, %v288_v0  ;;  %v351_v42 = vrot.slane %v2689_v15, 1  ;;  %v2723_v49 = vsel %vm279_vm1, %v330_v30, %v331_v31  ;;  %v2732_v52 = vld [vmem:[%s2512_s27 + $0x160] sm:$0x3]  ;;  %v173_v0 = vld [vmem:[%s3783_s1 + $0x18] sm:$0xf] }
  0x21   : > { %3874 = vst [vmem:[#allocation15_spill] sm:$0xff] %v2665_v1  ;;  %v2738_v62 = vsel %vm279_vm1, %v290_v43, %v291_v44  ;;  %v2741_v63 = vld [vmem:[%s2512_s27 + $0x40] sm:$0x3]  ;;  %v174_v22 = vld [vmem:[%s3783_s1 + $0x1c] sm:$0xf]  ;;  %v353_v43 = vrot.slane %v2732_v52, 1  ;;  %2309 = vmatpush.msk.msra.mxu2 %vm425_vm0, %v173_v0 }
  0x22   : > { %3875 = vst [vmem:[#allocation16_spill] sm:$0xff] %v2671_v3  ;;  %v2726_v50 = vsel %vm279_vm1, %v350_v32, %v351_v42  ;;  %v172_v30 = vld [vmem:[%s3783_s1 + $0x14] sm:$0xf]  ;;  %v333_v32 = vrot.slane %v2729_v51, 1  ;;  %2342 = vmatpush.msk.msra.mxu3 %vm425_vm0, %v174_v22  ;;  %v2774_v0 = vld [vmem:[%s2512_s27 + $0xa8] sm:$0xff] }
  0x23   : > { %3876 = vst [vmem:[#allocation17_spill] sm:$0xff] %v2686_v14  ;;  %2276 = vmatpush.msk.msra.mxu1 %vm425_vm0, %v172_v30  ;;  %v2777_v22 = vld [vmem:[%s2512_s27 + $0xb0] sm:$0xff]  ;;  %v2780_v14 = vld [vmem:[%s2512_s27 + $0x108] sm:$0xff]  ;;  %v2833_v24 = vld [vmem:[%s2512_s27 + $0x118] sm:$0x3] }
  0x24   : > { %3877 = vst [vmem:[#allocation18_spill] sm:$0xff] %v2689_v15  ;;  %v293_v15 = vrot.slane %v2741_v63, 1  ;;  %v2768_v58 = vsel %vm279_vm1, %v331_v31, %v333_v32  ;;  %v2783_v30 = vld [vmem:[%s2512_s27 + $0x110] sm:$0xff]  ;;  %v315_v31 = vrot.slane %v2774_v0, 1 }
  0x25   : > { %2122 = vmatmul.msk.f32.gmra.mxu1 %vm360_vm2, %v2629_v53  ;;  %3878 = vst [vmem:[#allocation19_spill] sm:$0xff] %v2717_v47  ;;  %v2789_v41 = vld [vmem:[%s2512_s27 + $0x170] sm:$0xff] }
  0x26   : > { %2130 = vmatmul.msk.f32.gmra.mxu2 %vm360_vm2, %v2632_v54  ;;  %3879 = vst [vmem:[#allocation20_spill] sm:$0xff] %v2726_v50  ;;  %v2806_v32 = vld [vmem:[%s2512_s27 + $0x50] sm:$0xff] }
  0x27   : > { %2138 = vmatmul.msk.f32.gmra.mxu3 %vm360_vm2, %v2635_v55  ;;  %3880 = vst [vmem:[#allocation21_spill] sm:$0xff] %v2729_v51  ;;  %v356_v55 = vrot.slane %v2789_v41, 1  ;;  %v296_v40 = vrot.slane %v2806_v32, 1 }
  0x28   : > { %2114 = vmatmul.msk.f32.gmra.mxu0 %vm360_vm2, %v2649_v59  ;;  %3881 = vst [vmem:[#allocation22_spill] sm:$0xff] %v2732_v52  ;;  %v2771_v52 = vsel %vm279_vm1, %v351_v42, %v353_v43  ;;  %v316_v42 = vrot.slane %v2777_v22, 1  ;;  %v336_v43 = vrot.slane %v2783_v30, 1 }
  0x29   : > { %3883 = vst [vmem:[#allocation24_spill] sm:$0xff] %v2771_v52 }
  0x2a   : > { %3884 = vst [vmem:[#allocation25_spill] sm:$0xff] %v2783_v30  ;;  %v2821_v35 = vsel %vm279_vm1, %v315_v31, %v316_v42  ;;  %v2849_v31 = vld [vmem:[%s2512_s27 + $0x58] sm:$0x3] }
  0x2b   : > { %3886 = vst [vmem:[#allocation27_spill] sm:$0xff] %v2789_v41  ;;  %v2830_v41 = vld [vmem:[%s2512_s27 + $0xb8] sm:$0x3] }
  0x2c   : > { %3887 = vst [vmem:[#allocation28_spill] sm:$0xff] %v2821_v35 }
  0x2d   : > { %2123 = vmatmul.msk.f32.gmra.mxu1 %vm360_vm2, %v2665_v1  ;;  %3890 = vst [vmem:[#allocation31_spill] sm:$0xff] %v2833_v24 }
  0x2e   : > { %2131 = vmatmul.msk.f32.gmra.mxu2 %vm360_vm2, %v2668_v2 }
  0x2f   : > { %2139 = vmatmul.msk.f32.gmra.mxu3 %vm360_vm2, %v2671_v3  ;;  %v2786_v3 = vld [vmem:[%s2512_s27 + $0x168] sm:$0xff] }
  0x30   : > { %2115 = vmatmul.msk.f32.gmra.mxu0 %vm360_vm2, %v2694_v16  ;;  %3885 = vst [vmem:[#allocation26_spill] sm:$0xff] %v2786_v3 }
  0x35   : > { %2124 = vmatmul.msk.f32.gmra.mxu1 %vm360_vm2, %v2717_v47 }
  0x36   : > { %2132 = vmatmul.msk.f32.gmra.mxu2 %vm360_vm2, %v2723_v49 }
  0x37   : > { %2140 = vmatmul.msk.f32.gmra.mxu3 %vm360_vm2, %v2726_v50  ;;  %v2765_v50 = vsel %vm279_vm1, %v311_v25, %v313_v60  ;;  %v2794_v25 = vsel %vm279_vm1, %v291_v44, %v293_v15  ;;  %v2803_v60 = vld [vmem:[%s2512_s27 + $0x48] sm:$0xff]  ;;  %v175_v15 = vld [vmem:[%s3783_s1 + $0x20] sm:$0xf]  ;;  %v335_v44 = vrot.slane %v2780_v14, 1 }
  0x38   : > { %2116 = vmatmul.msk.f32.gmra.mxu0 %vm360_vm2, %v2738_v62  ;;  %3882 = vst [vmem:[#allocation23_spill] sm:$0xff] %v2765_v50  ;;  %v295_v26 = vrot.slane %v2803_v60, 1 }
  0x39   : > { %2375 = vmatpush.msk.msra.mxu0 %vm425_vm0, %v175_v15  ;;  %v2824_v13 = vsel %vm279_vm1, %v335_v44, %v336_v43  ;;  %v2836_v15 = vld [vmem:[%s2512_s27 + $0x178] sm:$0x3]  ;;  %v338_v44 = vrot.slane %v2833_v24, 1 }
  0x3a   : > { %3888 = vst [vmem:[#allocation29_spill] sm:$0xff] %v2824_v13  ;;  %v2841_v12 = vsel %vm279_vm1, %v295_v26, %v296_v40  ;;  %v358_v30 = vrot.slane %v2836_v15, 1  ;;  %v298_v26 = vrot.slane %v2849_v31, 1 }
  0x3c   : > { %v2868_v24 = vsel %vm279_vm1, %v296_v40, %v298_v26  ;;  %v726_v40 = vrot.slane %v2572_v28, 2  ;;  %v738_v26 = vrot.slane %v2803_v60, 2 }
  0x3d   : > { %2125 = vmatmul.msk.f32.gmra.mxu1 %vm360_vm2, %v2765_v50 }
  0x3e   : > { %2133 = vmatmul.msk.f32.gmra.mxu2 %vm360_vm2, %v2768_v58 }
  0x3f   : > { %2141 = vmatmul.msk.f32.gmra.mxu3 %vm360_vm2, %v2771_v52  ;;  %v355_v52 = vrot.slane %v2786_v3, 1 }
  0x40   : > { %2117 = vmatmul.msk.f32.gmra.mxu0 %vm360_vm2, %v2794_v25 }
  0x41   : > { %v2827_v3 = vsel %vm279_vm1, %v355_v52, %v356_v55  ;;  %v318_v52 = vrot.slane %v2830_v41, 1 }
  0x42   : > { %3889 = vst [vmem:[#allocation30_spill] sm:$0xff] %v2827_v3 }
  0x43   : > { %v2857_v51 = vsel %vm279_vm1, %v316_v42, %v318_v52  ;;  %v723_v42 = vrot.slane %v2542_v18, 2  ;;  %v729_v52 = vrot.slane %v2619_v46, 2 }
  0x44   : > { %3891 = vst [vmem:[#allocation32_spill] sm:$0xff] %v2857_v51 }
  0x45   : > { %2126 = vmatmul.msk.f32.gmra.mxu1 %vm360_vm2, %v2821_v35 }
  0x46   : > { %2134 = vmatmul.msk.f32.gmra.mxu2 %vm360_vm2, %v2824_v13  ;;  %v2860_v13 = vsel %vm279_vm1, %v336_v43, %v338_v44  ;;  %v724_v43 = vrot.slane %v2551_v21, 2 }
  0x47   : > { %2142 = vmatmul.msk.f32.gmra.mxu3 %vm360_vm2, %v2827_v3  ;;  %v2863_v3 = vsel %vm279_vm1, %v356_v55, %v358_v30 }
  0x48   : > { %2118 = vmatmul.msk.f32.gmra.mxu0 %vm360_vm2, %v2841_v12  ;;  %3892 = vst [vmem:[#allocation33_spill] sm:$0xff] %v2863_v3  ;;  %v725_v55 = vsel %vm722_vm3, %v723_v42, %v724_v43  ;;  %v727_v30 = vsel %vm722_vm3, %v724_v43, %v726_v40  ;;  %v739_v42 = vrot.slane %v2806_v32, 2  ;;  %v741_v43 = vrot.slane %v2849_v31, 2 }
  0x49   : > { %v743_v40 = vrot.slane %v2515_v5, 2 }
  0x4d   : > { %2127 = vmatmul.msk.f32.gmra.mxu1 %vm360_vm2, %v2857_v51 }
  0x4e   : > { %2135 = vmatmul.msk.f32.gmra.mxu2 %vm360_vm2, %v2860_v13 }
  0x4f   : > { %2143 = vmatmul.msk.f32.gmra.mxu3 %vm360_vm2, %v2863_v3 }
  0x50   : > { %2119 = vmatmul.msk.f32.gmra.mxu0 %vm360_vm2, %v2868_v24 }
  0x55   : > { %2145 = vmatmul.msk.f32.vlgmr.msrb.gmra.mxu1 %vm360_vm2, %v2542_v18  ;;  %v728_v18 = vrot.slane %v2616_v45, 2 }
  0x56   : > { %2178 = vmatmul.msk.f32.vlgmr.msrb.gmra.mxu2 %vm360_vm2, %v725_v55  ;;  %v2960_v55 = vsel %vm722_vm3, %v739_v42, %v741_v43 }
  0x57   : > { %2211 = vmatmul.msk.f32.vlgmr.msrb.gmra.mxu3 %vm360_vm2, %v2616_v45  ;;  %v2898_v28 = vsel %vm722_vm3, %v728_v18, %v729_v52 }
  0x58   : > { %2244 = vmatmul.msk.f32.vlgmr.msrb.gmra.mxu0 %vm360_vm2, %v2649_v59 }
  0x5d   : > { %2146 = vmatmul.msk.f32.gmra.mxu1 %vm360_vm2, %v2551_v21  ;;  %v731_v21 = vrot.slane %v2657_v61, 2 }
  0x5e   : > { %2179 = vmatmul.msk.f32.gmra.mxu2 %vm360_vm2, %v727_v30  ;;  %v744_v30 = vrot.slane %v2518_v6, 2 }
  0x5f   : > { %2212 = vmatmul.msk.f32.gmra.mxu3 %vm360_vm2, %v2619_v46  ;;  %v2910_v59 = vsel %vm722_vm3, %v729_v52, %v731_v21  ;;  %v746_v21 = vrot.slane %v2539_v17, 2  ;;  %v748_v17 = vrot.slane %v2589_v36, 2 }
  0x60   : > { %2245 = vmatmul.msk.f32.gmra.mxu0 %vm360_vm2, %v2694_v16  ;;  %v734_v16 = vrot.slane %v2706_v29, 2  ;;  %v2975_v18 = vsel %vm722_vm3, %v743_v40, %v744_v30 }
  0x61   : > { %3893 = vst [vmem:[#allocation34_spill] sm:$0xff] %v2975_v18 }
  0x65   : > { %2147 = vmatmul.msk.f32.gmra.mxu1 %vm360_vm2, %v2616_v45  ;;  %v733_v45 = vrot.slane %v2703_v27, 2 }
  0x66   : > { %2180 = vmatmul.msk.f32.gmra.mxu2 %vm360_vm2, %v2898_v28 }
  0x67   : > { %2213 = vmatmul.msk.f32.gmra.mxu3 %vm360_vm2, %v2703_v27  ;;  %v2923_v61 = vsel %vm722_vm3, %v733_v45, %v734_v16 }
  0x68   : > { %2246 = vmatmul.msk.f32.gmra.mxu0 %vm360_vm2, %v2738_v62 }
  0x6d   : > { %2148 = vmatmul.msk.f32.gmra.mxu1 %vm360_vm2, %v2619_v46  ;;  %v736_v46 = vrot.slane %v2741_v63, 2  ;;  %v2948_v63 = vsel %vm722_vm3, %v738_v26, %v739_v42  ;;  %v749_v42 = vrot.slane %v2592_v37, 2 }
  0x6e   : > { %2181 = vmatmul.msk.f32.gmra.mxu2 %vm360_vm2, %v2910_v59 }
  0x6f   : > { %2214 = vmatmul.msk.f32.gmra.mxu3 %vm360_vm2, %v2706_v29  ;;  %v2935_v44 = vsel %vm722_vm3, %v734_v16, %v736_v46 }
  0x70   : > { %2247 = vmatmul.msk.f32.gmra.mxu0 %vm360_vm2, %v2794_v25 }
  0x75   : > { %2149 = vmatmul.msk.f32.gmra.mxu1 %vm360_vm2, %v2703_v27 }
  0x76   : > { %2182 = vmatmul.msk.f32.gmra.mxu2 %vm360_vm2, %v2923_v61 }
  0x77   : > { %2215 = vmatmul.msk.f32.gmra.mxu3 %vm360_vm2, %v2803_v60 }
  0x78   : > { %2248 = vmatmul.msk.f32.gmra.mxu0 %vm360_vm2, %v2841_v12 }
  0x7d   : > { %2150 = vmatmul.msk.f32.gmra.mxu1 %vm360_vm2, %v2706_v29 }
  0x7e   : > { %2183 = vmatmul.msk.f32.gmra.mxu2 %vm360_vm2, %v2935_v44 }
  0x7f   : > { %2216 = vmatmul.msk.f32.gmra.mxu3 %vm360_vm2, %v2806_v32 }
  0x80   : > { %2249 = vmatmul.msk.f32.gmra.mxu0 %vm360_vm2, %v2868_v24 }
  0x85   : > { %2151 = vmatmul.msk.f32.gmra.mxu1 %vm360_vm2, %v2803_v60 }
  0x86   : > { %2184 = vmatmul.msk.f32.gmra.mxu2 %vm360_vm2, %v2948_v63 }
  0x87   : > { %2217 = vmatmul.msk.f32.gmra.mxu3 %vm360_vm2, %v2515_v5 }
  0x88   : > { %2250 = vmatmul.msk.f32.gmra.mxu0 %vm360_vm2, %v2545_v19 }
  0x8d   : > { %2152 = vmatmul.msk.f32.gmra.mxu1 %vm360_vm2, %v2806_v32 }
  0x8e   : > { %2185 = vmatmul.msk.f32.gmra.mxu2 %vm360_vm2, %v2960_v55 }
  0x8f   : > { %2218 = vmatmul.msk.f32.gmra.mxu3 %vm360_vm2, %v2518_v6 }
  0x90   : > { %2251 = vmatmul.msk.f32.gmra.mxu0 %vm360_vm2, %v2580_v33 }
  0x92   : > { %v2972_v31 = vpop.f32.mrf.mxu1 }
  0x95   : > { %2153 = vmatmul.msk.f32.gmra.mxu1 %vm360_vm2, %v2515_v5  ;;  %v2979_v52 = vpop.f32.mrf.mxu0  ;;  %v2995_v5 = vsel %vm722_vm3, %v744_v30, %v746_v21  ;;  %v3016_v30 = vsel %vm722_vm3, %v748_v17, %v749_v42 }
  0x96   : > { %2186 = vmatmul.msk.f32.gmra.mxu2 %vm360_vm2, %v2975_v18  ;;  %3895 = vst [vmem:[#allocation36_spill] sm:$0xff] %v2995_v5 }
  0x97   : > { %2219 = vmatmul.msk.f32.gmra.mxu3 %vm360_vm2, %v2589_v36  ;;  %3897 = vst [vmem:[#allocation38_spill] sm:$0xff] %v3016_v30 }
  0x98   : > { %2252 = vmatmul.msk.f32.gmra.mxu0 %vm360_vm2, %v2629_v53 }
  0x99   : > { %v2988_v45 = vpop.f32.mrf.mxu2 }
  0x9a   : > { %v2990_v16 = vpop.f32.mrf.mxu3  ;;  %v2992_v46 = vpop.f32.mrf.mxu1 }
  0x9b   : > { %3894 = vst [vmem:[#allocation35_spill] sm:$0xff] %v2990_v16  ;;  %v751_v16 = vrot.slane %v2638_v56, 2  ;;  %v753_v56 = vrot.slane %v2674_v4, 2 }
  0x9d   : > { %2154 = vmatmul.msk.f32.gmra.mxu1 %vm360_vm2, %v2518_v6  ;;  %v2999_v26 = vpop.f32.mrf.mxu0 }
  0x9e   : > { %2187 = vmatmul.msk.f32.gmra.mxu2 %vm360_vm2, %v2995_v5 }
  0x9f   : > { %2220 = vmatmul.msk.f32.gmra.mxu3 %vm360_vm2, %v2592_v37 }
  0xa0   : > { %2253 = vmatmul.msk.f32.gmra.mxu0 %vm360_vm2, %v2665_v1 }
  0xa1   : > { %v3009_v43 = vpop.f32.mrf.mxu2 }
  0xa2   : > { %v3011_v40 = vpop.f32.mrf.mxu3  ;;  %v3013_v6 = vpop.f32.mrf.mxu1 }
  0xa3   : > { %3896 = vst [vmem:[#allocation37_spill] sm:$0xff] %v3011_v40 }
  0xa5   : > { %2155 = vmatmul.msk.f32.gmra.mxu1 %vm360_vm2, %v2589_v36  ;;  %v3020_v21 = vpop.f32.mrf.mxu0  ;;  %v3036_v36 = vsel %vm722_vm3, %v749_v42, %v751_v16 }
  0xa6   : > { %2188 = vmatmul.msk.f32.gmra.mxu2 %vm360_vm2, %v3016_v30  ;;  %3899 = vst [vmem:[#allocation40_spill] sm:$0xff] %v3036_v36 }
  0xa7   : > { %2221 = vmatmul.msk.f32.gmra.mxu3 %vm360_vm2, %v2674_v4 }
  0xa8   : > { %2254 = vmatmul.msk.f32.gmra.mxu0 %vm360_vm2, %v2717_v47 }
  0xa9   : > { %v3029_v40 = vpop.f32.mrf.mxu2 }
  0xaa   : > { %v3031_v17 = vpop.f32.mrf.mxu3  ;;  %v3033_v1 = vpop.f32.mrf.mxu1 }
  0xab   : > { %3898 = vst [vmem:[#allocation39_spill] sm:$0xff] %v3031_v17  ;;  %v754_v17 = vrot.slane %v2677_v8, 2 }
  0xad   : > { %2156 = vmatmul.msk.f32.gmra.mxu1 %vm360_vm2, %v2592_v37  ;;  %v3040_v30 = vpop.f32.mrf.mxu0  ;;  %v3057_v47 = vsel %vm722_vm3, %v753_v56, %v754_v17 }
  0xae   : > { %2189 = vmatmul.msk.f32.gmra.mxu2 %vm360_vm2, %v3036_v36  ;;  %3901 = vst [vmem:[#allocation42_spill] sm:$0xff] %v3057_v47 }
  0xaf   : > { %2222 = vmatmul.msk.f32.gmra.mxu3 %vm360_vm2, %v2677_v8 }
  0xb0   : > { %2255 = vmatmul.msk.f32.gmra.mxu0 %vm360_vm2, %v2765_v50  ;;  %v756_v50 = vrot.slane %v2720_v48, 2  ;;  %v758_v48 = vrot.slane %v2774_v0, 2 }
  0xb1   : > { %v3050_v16 = vpop.f32.mrf.mxu2 }
  0xb2   : > { %v3052_v42 = vpop.f32.mrf.mxu3  ;;  %v3054_v37 = vpop.f32.mrf.mxu1 }
  0xb3   : > { %3900 = vst [vmem:[#allocation41_spill] sm:$0xff] %v3052_v42 }
  0xb5   : > { %2157 = vmatmul.msk.f32.gmra.mxu1 %vm360_vm2, %v2674_v4  ;;  %v3061_v36 = vpop.f32.mrf.mxu0  ;;  %v3077_v4 = vsel %vm722_vm3, %v754_v17, %v756_v50 }
  0xb6   : > { %2190 = vmatmul.msk.f32.gmra.mxu2 %vm360_vm2, %v3057_v47  ;;  %3903 = vst [vmem:[#allocation44_spill] sm:$0xff] %v3077_v4 }
  0xb7   : > { %2223 = vmatmul.msk.f32.gmra.mxu3 %vm360_vm2, %v2774_v0 }
  0xb8   : > { %2256 = vmatmul.msk.f32.gmra.mxu0 %vm360_vm2, %v2821_v35 }
  0xb9   : > { %v3070_v42 = vpop.f32.mrf.mxu2 }
  0xba   : > { %v3072_v56 = vpop.f32.mrf.mxu3  ;;  %v3074_v53 = vpop.f32.mrf.mxu1 }
  0xbb   : > { %3902 = vst [vmem:[#allocation43_spill] sm:$0xff] %v3072_v56  ;;  %v759_v56 = vrot.slane %v2777_v22, 2 }
  0xbd   : > { %2158 = vmatmul.msk.f32.gmra.mxu1 %vm360_vm2, %v2677_v8  ;;  %v3081_v47 = vpop.f32.mrf.mxu0  ;;  %v3098_v35 = vsel %vm722_vm3, %v758_v48, %v759_v56 }
  0xbe   : > { %2191 = vmatmul.msk.f32.gmra.mxu2 %vm360_vm2, %v3077_v4  ;;  %3906 = vst [vmem:[#allocation47_spill] sm:$0xff] %v3098_v35 }
  0xbf   : > { %2224 = vmatmul.msk.f32.gmra.mxu3 %vm360_vm2, %v2777_v22 }
  0xc0   : > { %2257 = vmatmul.msk.f32.gmra.mxu0 %vm360_vm2, %v2857_v51  ;;  %v761_v51 = vrot.slane %v2830_v41, 2  ;;  %v763_v41 = vrot.slane %v2521_v7, 2 }
  0xc1   : > { %v3091_v50 = vpop.f32.mrf.mxu2 }
  0xc2   : > { %3904 = vst [vmem:[#allocation45_spill] sm:$0xff] %v3091_v50  ;;  %v3093_v17 = vpop.f32.mrf.mxu3  ;;  %v3095_v8 = vpop.f32.mrf.mxu1 }
  0xc3   : > { %3905 = vst [vmem:[#allocation46_spill] sm:$0xff] %v3093_v17 }
  0xc5   : > { %2159 = vmatmul.msk.f32.gmra.mxu1 %vm360_vm2, %v2774_v0  ;;  %v3102_v4 = vpop.f32.mrf.mxu0  ;;  %v3118_v0 = vsel %vm722_vm3, %v759_v56, %v761_v51 }
  0xc6   : > { %2192 = vmatmul.msk.f32.gmra.mxu2 %vm360_vm2, %v3098_v35  ;;  %3909 = vst [vmem:[#allocation50_spill] sm:$0xff] %v3118_v0 }
  0xc7   : > { %2225 = vmatmul.msk.f32.gmra.mxu3 %vm360_vm2, %v2521_v7 }
  0xc8   : > { %2258 = vmatmul.msk.f32.gmra.mxu0 %vm360_vm2, %v2557_v23 }
  0xc9   : > { %v3111_v17 = vpop.f32.mrf.mxu2 }
  0xca   : > { %3907 = vst [vmem:[#allocation48_spill] sm:$0xff] %v3111_v17  ;;  %v3113_v48 = vpop.f32.mrf.mxu3  ;;  %v3115_v5 = vpop.f32.mrf.mxu1 }
  0xcb   : > { %3908 = vst [vmem:[#allocation49_spill] sm:$0xff] %v3113_v48  ;;  %v764_v48 = vrot.slane %v2526_v10, 2 }
  0xcd   : > { %2160 = vmatmul.msk.f32.gmra.mxu1 %vm360_vm2, %v2777_v22  ;;  %v3122_v35 = vpop.f32.mrf.mxu0  ;;  %v3137_v23 = vsel %vm722_vm3, %v763_v41, %v764_v48 }
  0xce   : > { %2193 = vmatmul.msk.f32.gmra.mxu2 %vm360_vm2, %v3118_v0  ;;  %3912 = vst [vmem:[#allocation53_spill] sm:$0xff] %v3137_v23 }
  0xcf   : > { %2226 = vmatmul.msk.f32.gmra.mxu3 %vm360_vm2, %v2526_v10 }
  0xd0   : > { %2259 = vmatmul.msk.f32.gmra.mxu0 %vm360_vm2, %v2583_v34  ;;  %v766_v34 = vrot.slane %v2548_v20, 2  ;;  %v768_v20 = vrot.slane %v2595_v38, 2 }
  0xd1   : > { %v3132_v51 = vpop.f32.mrf.mxu2 }
  0xd2   : > { %3910 = vst [vmem:[#allocation51_spill] sm:$0xff] %v3132_v51  ;;  %v3134_v56 = vpop.f32.mrf.mxu3  ;;  %v626_v22 = vpop.f32.mrf.mxu1 }
  0xd3   : > { %3911 = vst [vmem:[#allocation52_spill] sm:$0xff] %v3134_v56  ;;  %v627_v51 = vadd.f32 %v626_v22, %v2979_v52  ;;  %v769_v52 = vrot.slane %v2598_v39, 2 }
  0xd5   : > { %2161 = vmatmul.msk.f32.gmra.mxu1 %vm360_vm2, %v2521_v7  ;;  %v1199_v0 = vpop.f32.mrf.mxu0  ;;  %v3150_v7 = vsel %vm722_vm3, %v764_v48, %v766_v34 }
  0xd6   : > { %2194 = vmatmul.msk.f32.gmra.mxu2 %vm360_vm2, %v3137_v23 }
  0xd7   : > { %2227 = vmatmul.msk.f32.gmra.mxu3 %vm360_vm2, %v2595_v38 }
  0xd8   : > { %2260 = vmatmul.msk.f32.gmra.mxu0 %vm360_vm2, %v2632_v54 }
  0xd9   : > { %v887_v56 = vpop.f32.mrf.mxu2 }
  0xda   : > { %v1041_v41 = vpop.f32.mrf.mxu3  ;;  %v983_v17 = vadd.f32 %v887_v56, %v627_v51  ;;  %v629_v50 = vpop.f32.mrf.mxu1 }
  0xdb   : > { %v630_v34 = vadd.f32 %v629_v50, %v2999_v26  ;;  %v771_v26 = vrot.slane %v2641_v57, 2  ;;  %v773_v57 = vrot.slane %v2680_v9, 2 }
  0xdc   : > { %v1137_v33 = vadd.f32 %v1041_v41, %v983_v17 }
  0xdd   : > { %2162 = vmatmul.msk.f32.gmra.mxu1 %vm360_vm2, %v2526_v10  ;;  %v1202_v23 = vpop.f32.mrf.mxu0 }
  0xde   : > { %v3154_v18 = vadd.f32 %v1199_v0, %v1137_v33  ;;  %2195 = vmatmul.msk.f32.gmra.mxu2 %vm360_vm2, %v3150_v7  ;;  %v3166_v0 = vsel %vm722_vm3, %v768_v20, %v769_v52 }
  0xdf   : > { %2228 = vmatmul.msk.f32.gmra.mxu3 %vm360_vm2, %v2598_v39 }
  0xe0   : > { %2261 = vmatmul.msk.f32.gmra.mxu0 %vm360_vm2, %v2668_v2 }
  0xe1   : > { %v890_v17 = vpop.f32.mrf.mxu2 }
  0xe2   : > { %v1044_v10 = vpop.f32.mrf.mxu3  ;;  %v984_v48 = vadd.f32 %v890_v17, %v630_v34  ;;  %v632_v33 = vpop.f32.mrf.mxu1 }
  0xe3   : > { %v633_v50 = vadd.f32 %v632_v33, %v3020_v21  ;;  %v774_v21 = vrot.slane %v2683_v11, 2 }
  0xe4   : > { %v1138_v51 = vadd.f32 %v1044_v10, %v984_v48 }
  0xe5   : > { %2163 = vmatmul.msk.f32.gmra.mxu1 %vm360_vm2, %v2595_v38  ;;  %v1205_v56 = vpop.f32.mrf.mxu0 }
  0xe6   : > { %v3170_v22 = vadd.f32 %v1202_v23, %v1138_v51  ;;  %2196 = vmatmul.msk.f32.gmra.mxu2 %vm360_vm2, %v3166_v0  ;;  %v3181_v23 = vsel %vm722_vm3, %v769_v52, %v771_v26  ;;  %v3197_v26 = vsel %vm722_vm3, %v773_v57, %v774_v21 }
  0xe7   : > { %2229 = vmatmul.msk.f32.gmra.mxu3 %vm360_vm2, %v2680_v9 }
  0xe8   : > { %2262 = vmatmul.msk.f32.gmra.mxu0 %vm360_vm2, %v2723_v49 }
  0xe9   : > { %v893_v41 = vpop.f32.mrf.mxu2 }
  0xea   : > { %v1047_v20 = vpop.f32.mrf.mxu3  ;;  %v985_v34 = vadd.f32 %v893_v41, %v633_v50  ;;  %v635_v38 = vpop.f32.mrf.mxu1 }
  0xeb   : > { %v636_v52 = vadd.f32 %v635_v38, %v3040_v30  ;;  %v3914_v30 = vld [vmem:[#allocation21_spill] sm:$0xff] }
  0xec   : > { %v1139_v17 = vadd.f32 %v1047_v20, %v985_v34  ;;  %v776_v34 = vrot.slane %v3914_v30, 2 }
  0xed   : > { %2164 = vmatmul.msk.f32.gmra.mxu1 %vm360_vm2, %v2598_v39  ;;  %v1208_v10 = vpop.f32.mrf.mxu0 }
  0xee   : > { %v3185_v48 = vadd.f32 %v1205_v56, %v1139_v17  ;;  %2197 = vmatmul.msk.f32.gmra.mxu2 %vm360_vm2, %v3181_v23  ;;  %v3915_v17 = vld [vmem:[#allocation29_spill] sm:$0xff] }
  0xef   : > { %2230 = vmatmul.msk.f32.gmra.mxu3 %vm360_vm2, %v2683_v11 }
  0xf0   : > { %2263 = vmatmul.msk.f32.gmra.mxu0 %vm360_vm2, %v2768_v58 }
  0xf1   : > { %v896_v33 = vpop.f32.mrf.mxu2 }
  0xf2   : > { %v1050_v39 = vpop.f32.mrf.mxu3  ;;  %v986_v51 = vadd.f32 %v896_v33, %v636_v52  ;;  %v638_v56 = vpop.f32.mrf.mxu1 }
  0xf3   : > { %v639_v38 = vadd.f32 %v638_v56, %v3061_v36  ;;  %v3917_v36 = vld [vmem:[#allocation25_spill] sm:$0xff]  ;;  %v778_v56 = vrot.slane %v2780_v14, 2 }
  0xf4   : > { %v1140_v50 = vadd.f32 %v1050_v39, %v986_v51  ;;  %v779_v30 = vrot.slane %v3917_v36, 2 }
  0xf5   : > { %2165 = vmatmul.msk.f32.gmra.mxu1 %vm360_vm2, %v2680_v9  ;;  %v1211_v41 = vpop.f32.mrf.mxu0 }
  0xf6   : > { %v3201_v20 = vadd.f32 %v1208_v10, %v1140_v50  ;;  %2198 = vmatmul.msk.f32.gmra.mxu2 %vm360_vm2, %v3197_v26  ;;  %v3212_v10 = vsel %vm722_vm3, %v774_v21, %v776_v34 }
  0xf7   : > { %2231 = vmatmul.msk.f32.gmra.mxu3 %vm360_vm2, %v2780_v14 }
  0xf8   : > { %3913 = vst [vmem:[#allocation54_spill] sm:$0xff] %v3201_v20  ;;  %2264 = vmatmul.msk.f32.gmra.mxu0 %vm360_vm2, %v3915_v17 }
  0xf9   : > { %v899_v57 = vpop.f32.mrf.mxu2 }
  0xfa   : > { %v1053_v52 = vpop.f32.mrf.mxu3  ;;  %v987_v33 = vadd.f32 %v899_v57, %v639_v38  ;;  %v641_v9 = vpop.f32.mrf.mxu1  ;;  %v3228_v57 = vsel %vm722_vm3, %v778_v56, %v779_v30 }
  0xfb   : > { %v642_v21 = vadd.f32 %v641_v9, %v3081_v47  ;;  %v3919_v47 = vld [vmem:[#allocation2_spill] sm:$0xff]  ;;  %v3920_v9 = vld [vmem:[#allocation31_spill] sm:$0xff] }
  0xfc   : > { %v1141_v39 = vadd.f32 %v1053_v52, %v987_v33 }
  0xfd   : > { %2166 = vmatmul.msk.f32.gmra.mxu1 %vm360_vm2, %v2683_v11  ;;  %v1214_v51 = vpop.f32.mrf.mxu0 }
  0xfe   : > { %v3216_v50 = vadd.f32 %v1211_v41, %v1141_v39  ;;  %2199 = vmatmul.msk.f32.gmra.mxu2 %vm360_vm2, %v3212_v10 }
  0xff   : > { %2232 = vmatmul.msk.f32.gmra.mxu3 %vm360_vm2, %v3917_v36 }
 0x100   : > { %3916 = vst [vmem:[#allocation21_spill] sm:$0xff] %v3216_v50  ;;  %2265 = vmatmul.msk.f32.gmra.mxu0 %vm360_vm2, %v2860_v13  ;;  %v781_v50 = vrot.slane %v3920_v9, 2 }
 0x101   : > { %v902_v34 = vpop.f32.mrf.mxu2 }
 0x102   : > { %v1056_v11 = vpop.f32.mrf.mxu3  ;;  %v988_v38 = vadd.f32 %v902_v34, %v642_v21  ;;  %v644_v41 = vpop.f32.mrf.mxu1  ;;  %v3921_v34 = vld [vmem:[#allocation5_spill] sm:$0xff] }
 0x103   : > { %v645_v21 = vadd.f32 %v644_v41, %v3102_v4  ;;  %v3923_v4 = vld [vmem:[#allocation3_spill] sm:$0xff]  ;;  %v783_v41 = vrot.slane %v3919_v47, 2 }
 0x104   : > { %v1142_v52 = vadd.f32 %v1056_v11, %v988_v38  ;;  %v784_v9 = vrot.slane %v3923_v4, 2 }
 0x105   : > { %2167 = vmatmul.msk.f32.gmra.mxu1 %vm360_vm2, %v2780_v14  ;;  %v1217_v33 = vpop.f32.mrf.mxu0 }
 0x106   : > { %v3232_v39 = vadd.f32 %v1214_v51, %v1142_v52  ;;  %2200 = vmatmul.msk.f32.gmra.mxu2 %vm360_vm2, %v3228_v57  ;;  %v3243_v51 = vsel %vm722_vm3, %v779_v30, %v781_v50  ;;  %v3924_v30 = vld [vmem:[#allocation9_spill] sm:$0xff] }
 0x107   : > { %2233 = vmatmul.msk.f32.gmra.mxu3 %vm360_vm2, %v3919_v47 }
 0x108   : > { %3918 = vst [vmem:[#allocation29_spill] sm:$0xff] %v3232_v39  ;;  %2266 = vmatmul.msk.f32.gmra.mxu0 %vm360_vm2, %v3921_v34 }
 0x109   : > { %v905_v56 = vpop.f32.mrf.mxu2 }
 0x10a   : > { %v1059_v11 = vpop.f32.mrf.mxu3  ;;  %v989_v38 = vadd.f32 %v905_v56, %v645_v21  ;;  %v647_v14 = vpop.f32.mrf.mxu1 }
 0x10b   : > { %v648_v50 = vadd.f32 %v647_v14, %v3122_v35  ;;  %v3927_v35 = vld [vmem:[#allocation10_spill] sm:$0xff] }
 0x10c   : > { %v1143_v52 = vadd.f32 %v1059_v11, %v989_v38  ;;  %v3259_v11 = vsel %vm722_vm3, %v783_v41, %v784_v9  ;;  %v3928_v14 = vld [vmem:[#allocation6_spill] sm:$0xff] }
 0x10d   : > { %2168 = vmatmul.msk.f32.gmra.mxu1 %vm360_vm2, %v3917_v36  ;;  %v1220_v39 = vpop.f32.mrf.mxu0  ;;  %3925 = vst [vmem:[#allocation2_spill] sm:$0xff] %v3259_v11 }
 0x10e   : > { %v3247_v20 = vadd.f32 %v1217_v33, %v1143_v52  ;;  %2201 = vmatmul.msk.f32.gmra.mxu2 %vm360_vm2, %v3243_v51 }
 0x10f   : > { %2234 = vmatmul.msk.f32.gmra.mxu3 %vm360_vm2, %v3923_v4 }
 0x110   : > { %3922 = vst [vmem:[#allocation25_spill] sm:$0xff] %v3247_v20  ;;  %2267 = vmatmul.msk.f32.gmra.mxu0 %vm360_vm2, %v3924_v30  ;;  %v786_v30 = vrot.slane %v3928_v14, 2 }
 0x111   : > { %v908_v21 = vpop.f32.mrf.mxu2 }
 0x112   : > { %v1062_v36 = vpop.f32.mrf.mxu3  ;;  %v990_v56 = vadd.f32 %v908_v21, %v648_v50  ;;  %v650_v33 = vpop.f32.mrf.mxu1  ;;  %v3929_v21 = vld [vmem:[#allocation13_spill] sm:$0xff] }
 0x113   : > { %v651_v50 = vadd.f32 %v650_v33, %v2972_v31  ;;  %v3931_v31 = vld [vmem:[#allocation11_spill] sm:$0xff]  ;;  %v788_v33 = vrot.slane %v3927_v35, 2 }
 0x114   : > { %v1144_v38 = vadd.f32 %v1062_v36, %v990_v56  ;;  %v789_v14 = vrot.slane %v3931_v31, 2 }
 0x115   : > { %2169 = vmatmul.msk.f32.gmra.mxu1 %vm360_vm2, %v3919_v47  ;;  %v1223_v52 = vpop.f32.mrf.mxu0 }
 0x116   : > { %v3263_v20 = vadd.f32 %v1220_v39, %v1144_v38  ;;  %2202 = vmatmul.msk.f32.gmra.mxu2 %vm360_vm2, %v3259_v11  ;;  %v3274_v39 = vsel %vm722_vm3, %v784_v9, %v786_v30  ;;  %v3932_v30 = vld [vmem:[#allocation16_spill] sm:$0xff] }
 0x117   : > { %2235 = vmatmul.msk.f32.gmra.mxu3 %vm360_vm2, %v3927_v35 }
 0x118   : > { %3926 = vst [vmem:[#allocation31_spill] sm:$0xff] %v3263_v20  ;;  %2268 = vmatmul.msk.f32.gmra.mxu0 %vm360_vm2, %v3929_v21 }
 0x119   : > { %v911_v41 = vpop.f32.mrf.mxu2 }
 0x11a   : > { %v1065_v36 = vpop.f32.mrf.mxu3  ;;  %v991_v56 = vadd.f32 %v911_v41, %v651_v50  ;;  %v653_v47 = vpop.f32.mrf.mxu1 }
 0x11b   : > { %v654_v9 = vadd.f32 %v653_v47, %v2992_v46  ;;  %v3935_v46 = vld [vmem:[#allocation17_spill] sm:$0xff]  ;;  %v3936_v47 = vld [vmem:[#allocation14_spill] sm:$0xff] }
 0x11c   : > { %v1145_v38 = vadd.f32 %v1065_v36, %v991_v56  ;;  %v3290_v36 = vsel %vm722_vm3, %v788_v33, %v789_v14 }
 0x11d   : > { %2170 = vmatmul.msk.f32.gmra.mxu1 %vm360_vm2, %v3923_v4  ;;  %v1226_v20 = vpop.f32.mrf.mxu0  ;;  %3933 = vst [vmem:[#allocation3_spill] sm:$0xff] %v3290_v36 }
 0x11e   : > { %v3278_v11 = vadd.f32 %v1223_v52, %v1145_v38  ;;  %2203 = vmatmul.msk.f32.gmra.mxu2 %vm360_vm2, %v3274_v39 }
 0x11f   : > { %2236 = vmatmul.msk.f32.gmra.mxu3 %vm360_vm2, %v3931_v31 }
 0x120   : > { %3930 = vst [vmem:[#allocation5_spill] sm:$0xff] %v3278_v11  ;;  %2269 = vmatmul.msk.f32.gmra.mxu0 %vm360_vm2, %v3932_v30  ;;  %v791_v30 = vrot.slane %v3936_v47, 2 }
 0x121   : > { %v914_v50 = vpop.f32.mrf.mxu2 }
 0x122   : > { %v1068_v4 = vpop.f32.mrf.mxu3  ;;  %v992_v41 = vadd.f32 %v914_v50, %v654_v9  ;;  %v656_v52 = vpop.f32.mrf.mxu1  ;;  %v3937_v50 = vld [vmem:[#allocation20_spill] sm:$0xff] }
 0x123   : > { %v657_v9 = vadd.f32 %v656_v52, %v3013_v6  ;;  %v3939_v6 = vld [vmem:[#allocation18_spill] sm:$0xff]  ;;  %v793_v52 = vrot.slane %v3935_v46, 2 }
 0x124   : > { %v1146_v56 = vadd.f32 %v1068_v4, %v992_v41  ;;  %v794_v47 = vrot.slane %v3939_v6, 2 }
 0x125   : > { %2171 = vmatmul.msk.f32.gmra.mxu1 %vm360_vm2, %v3927_v35  ;;  %v1229_v38 = vpop.f32.mrf.mxu0 }
 0x126   : > { %v3294_v11 = vadd.f32 %v1226_v20, %v1146_v56  ;;  %2204 = vmatmul.msk.f32.gmra.mxu2 %vm360_vm2, %v3290_v36  ;;  %v3305_v20 = vsel %vm722_vm3, %v789_v14, %v791_v30  ;;  %v3940_v30 = vld [vmem:[#allocation24_spill] sm:$0xff] }
 0x127   : > { %2237 = vmatmul.msk.f32.gmra.mxu3 %vm360_vm2, %v3935_v46 }
 0x128   : > { %3934 = vst [vmem:[#allocation10_spill] sm:$0xff] %v3294_v11  ;;  %2270 = vmatmul.msk.f32.gmra.mxu0 %vm360_vm2, %v3937_v50 }
 0x129   : > { %v917_v33 = vpop.f32.mrf.mxu2 }
 0x12a   : > { %v1071_v4 = vpop.f32.mrf.mxu3  ;;  %v993_v41 = vadd.f32 %v917_v33, %v657_v9  ;;  %v659_v35 = vpop.f32.mrf.mxu1 }
 0x12b   : > { %v660_v14 = vadd.f32 %v659_v35, %v3033_v1  ;;  %v3943_v1 = vld [vmem:[#allocation26_spill] sm:$0xff] }
 0x12c   : > { %v1147_v56 = vadd.f32 %v1071_v4, %v993_v41  ;;  %v3321_v4 = vsel %vm722_vm3, %v793_v52, %v794_v47  ;;  %v3944_v35 = vld [vmem:[#allocation22_spill] sm:$0xff] }
 0x12d   : > { %2172 = vmatmul.msk.f32.gmra.mxu1 %vm360_vm2, %v3931_v31  ;;  %v1232_v11 = vpop.f32.mrf.mxu0  ;;  %3941 = vst [vmem:[#allocation13_spill] sm:$0xff] %v3321_v4  ;;  %v3945_v52 = vld [vmem:[#allocation30_spill] sm:$0xff] }
 0x12e   : > { %v3309_v36 = vadd.f32 %v1229_v38, %v1147_v56  ;;  %2205 = vmatmul.msk.f32.gmra.mxu2 %vm360_vm2, %v3305_v20 }
 0x12f   : > { %2238 = vmatmul.msk.f32.gmra.mxu3 %vm360_vm2, %v3939_v6 }
 0x130   : > { %3938 = vst [vmem:[#allocation6_spill] sm:$0xff] %v3309_v36  ;;  %2271 = vmatmul.msk.f32.gmra.mxu0 %vm360_vm2, %v3940_v30 }
 0x131   : > { %v920_v9 = vpop.f32.mrf.mxu2 }
 0x132   : > { %v1074_v31 = vpop.f32.mrf.mxu3  ;;  %v994_v33 = vadd.f32 %v920_v9, %v660_v14  ;;  %v662_v38 = vpop.f32.mrf.mxu1  ;;  %v796_v14 = vrot.slane %v3944_v35, 2  ;;  %v798_v35 = vrot.slane %v3943_v1, 2 }
 0x133   : > { %v663_v9 = vadd.f32 %v662_v38, %v3054_v37  ;;  %v3947_v37 = vld [vmem:[#allocation27_spill] sm:$0xff] }
 0x134   : > { %v1148_v41 = vadd.f32 %v1074_v31, %v994_v33  ;;  %v3347_v38 = vld [vmem:[%s2512_s27 + $0x188] sm:$0xff] }
 0x135   : > { %2173 = vmatmul.msk.f32.gmra.mxu1 %vm360_vm2, %v3935_v46  ;;  %v1235_v56 = vpop.f32.mrf.mxu0 }
 0x136   : > { %v3325_v36 = vadd.f32 %v1232_v11, %v1148_v41  ;;  %2206 = vmatmul.msk.f32.gmra.mxu2 %vm360_vm2, %v3321_v4  ;;  %v3336_v41 = vsel %vm722_vm3, %v794_v47, %v796_v14  ;;  %v799_v47 = vrot.slane %v3947_v37, 2 }
 0x137   : > { %2239 = vmatmul.msk.f32.gmra.mxu3 %vm360_vm2, %v3943_v1 }
 0x138   : > { %3942 = vst [vmem:[#allocation11_spill] sm:$0xff] %v3325_v36  ;;  %2272 = vmatmul.msk.f32.gmra.mxu0 %vm360_vm2, %v3945_v52 }
 0x139   : > { %v923_v31 = vpop.f32.mrf.mxu2 }
 0x13a   : > { %v1077_v46 = vpop.f32.mrf.mxu3  ;;  %v995_v33 = vadd.f32 %v923_v31, %v663_v9  ;;  %v665_v11 = vpop.f32.mrf.mxu1  ;;  %v3353_v9 = vld [vmem:[%s2512_s27 + $0x180] sm:$0xff]  ;;  %v1171_v31 = vrot.slane %v3347_v38, 1 }
 0x13b   : > { %v666_v14 = vadd.f32 %v665_v11, %v3074_v53  ;;  %3948 = vst [vmem:[#allocation14_spill] sm:$0xff] %v3353_v9 }
 0x13c   : > { %v1149_v36 = vadd.f32 %v1077_v46, %v995_v33 }
 0x13d   : > { %2174 = vmatmul.msk.f32.gmra.mxu1 %vm360_vm2, %v3939_v6  ;;  %v1238_v30 = vpop.f32.mrf.mxu0 }
 0x13e   : > { %v3340_v4 = vadd.f32 %v1235_v56, %v1149_v36  ;;  %2207 = vmatmul.msk.f32.gmra.mxu2 %vm360_vm2, %v3336_v41  ;;  %v1170_v56 = vrot.slane %v3353_v9, 1 }
 0x13f   : > { %2240 = vmatmul.msk.f32.gmra.mxu3 %vm360_vm2, %v3947_v37 }
 0x140   : > { %3946 = vst [vmem:[#allocation17_spill] sm:$0xff] %v3340_v4  ;;  %2273 = vmatmul.msk.f32.gmra.mxu0 %vm360_vm2, %v2863_v3  ;;  %v3360_v4 = vsel %vm722_vm3, %v798_v35, %v799_v47  ;;  %v3365_v11 = vsel %vm279_vm1, %v1170_v56, %v1171_v31  ;;  %v801_v35 = vrot.slane %v2836_v15, 2 }
 0x141   : > { %v926_v36 = vpop.f32.mrf.mxu2 }
 0x142   : > { %v1080_v6 = vpop.f32.mrf.mxu3  ;;  %v996_v46 = vadd.f32 %v926_v36, %v666_v14  ;;  %v668_v33 = vpop.f32.mrf.mxu1  ;;  %v3374_v14 = vld [vmem:[%s2512_s27 + $0x190] sm:$0x3] }
 0x143   : > { %v669_v36 = vadd.f32 %v668_v33, %v3095_v8 }
 0x144   : > { %v1150_v52 = vadd.f32 %v1080_v6, %v996_v46  ;;  %v3382_v46 = vsel %vm722_vm3, %v799_v47, %v801_v35 }
 0x145   : > { %2175 = vmatmul.msk.f32.gmra.mxu1 %vm360_vm2, %v3943_v1  ;;  %v1241_v53 = vpop.f32.mrf.mxu0 }
 0x146   : > { %v3367_v3 = vadd.f32 %v1238_v30, %v1150_v52  ;;  %2208 = vmatmul.msk.f32.gmra.mxu2 %vm360_vm2, %v3360_v4  ;;  %v1173_v30 = vrot.slane %v3374_v14, 1 }
 0x147   : > { %2241 = vmatmul.msk.f32.gmra.mxu3 %vm360_vm2, %v3353_v9 }
 0x148   : > { %3949 = vst [vmem:[#allocation20_spill] sm:$0xff] %v3367_v3  ;;  %2274 = vmatmul.msk.f32.gmra.mxu0 %vm360_vm2, %v3365_v11  ;;  %v3387_v15 = vsel %vm279_vm1, %v1171_v31, %v1173_v30 }
 0x149   : > { %v929_v1 = vpop.f32.mrf.mxu2 }
 0x14a   : > { %v1083_v6 = vpop.f32.mrf.mxu3  ;;  %v997_v52 = vadd.f32 %v929_v1, %v669_v36  ;;  %v671_v56 = vpop.f32.mrf.mxu1 }
 0x14b   : > { %v672_v33 = vadd.f32 %v671_v56, %v3115_v5 }
 0x14c   : > { %v1151_v3 = vadd.f32 %v1083_v6, %v997_v52 }
 0x14d   : > { %2176 = vmatmul.msk.f32.gmra.mxu1 %vm360_vm2, %v3947_v37  ;;  %v1244_v9 = vpop.f32.mrf.mxu0 }
 0x14e   : > { %v3389_v8 = vadd.f32 %v1241_v53, %v1151_v3  ;;  %2209 = vmatmul.msk.f32.gmra.mxu2 %vm360_vm2, %v3382_v46 }
 0x14f   : > { %2242 = vmatmul.msk.f32.gmra.mxu3 %vm360_vm2, %v3347_v38 }
 0x150   : > { %2275 = vmatmul.msk.f32.gmra.mxu0 %vm360_vm2, %v3387_v15 }
 0x151   : > { %v932_v47 = vpop.f32.mrf.mxu2 }
 0x152   : > { %v1086_v35 = vpop.f32.mrf.mxu3  ;;  %v998_v37 = vadd.f32 %v932_v47, %v672_v33  ;;  %v674_v36 = vpop.f32.mrf.mxu1 }
 0x153   : > { %v675_v5 = vadd.f32 %v674_v36, %v2988_v45 }
 0x154   : > { %v1152_v1 = vadd.f32 %v1086_v35, %v998_v37 }
 0x155   : > { %2277 = vmatmul.msk.f32.vlgmr.msra.gmra.mxu1 %vm360_vm2, %v2898_v28  ;;  %v1247_v3 = vpop.f32.mrf.mxu0 }
 0x156   : > { %v3400_v31 = vadd.f32 %v1244_v9, %v1152_v1  ;;  %2310 = vmatmul.msk.f32.vlgmr.msra.gmra.mxu2 %vm360_vm2, %v2703_v27 }
 0x157   : > { %2343 = vmatmul.msk.f32.vlgmr.msra.gmra.mxu3 %vm360_vm2, %v2738_v62 }
 0x158   : > { %2376 = vmatmul.msk.f32.vlgmr.msra.gmra.mxu0 %vm360_vm2, %v2923_v61 }
 0x159   : > { %v935_v53 = vpop.f32.mrf.mxu2 }
 0x15a   : > { %v1089_v6 = vpop.f32.mrf.mxu3  ;;  %v999_v30 = vadd.f32 %v935_v53, %v675_v5  ;;  %v677_v52 = vpop.f32.mrf.mxu1 }
 0x15b   : > { %v678_v27 = vadd.f32 %v677_v52, %v3009_v43 }
 0x15c   : > { %v1153_v56 = vadd.f32 %v1089_v6, %v999_v30 }
 0x15d   : > { %2278 = vmatmul.msk.f32.gmra.mxu1 %vm360_vm2, %v2910_v59  ;;  %v1250_v28 = vpop.f32.mrf.mxu0 }
 0x15e   : > { %v3411_v9 = vadd.f32 %v1247_v3, %v1153_v56  ;;  %2311 = vmatmul.msk.f32.gmra.mxu2 %vm360_vm2, %v2706_v29 }
 0x15f   : > { %2344 = vmatmul.msk.f32.gmra.mxu3 %vm360_vm2, %v2794_v25 }
 0x160   : > { %2377 = vmatmul.msk.f32.gmra.mxu0 %vm360_vm2, %v2935_v44 }
 0x161   : > { %v938_v62 = vpop.f32.mrf.mxu2 }
 0x162   : > { %v1092_v45 = vpop.f32.mrf.mxu3  ;;  %v1000_v33 = vadd.f32 %v938_v62, %v678_v27  ;;  %v680_v47 = vpop.f32.mrf.mxu1 }
 0x163   : > { %v681_v29 = vadd.f32 %v680_v47, %v3029_v40  ;;  %v2424_v47 = vld [vmem:[%s2512_s27 + $0x68] sm:$0xff] }
 0x164   : > { %v1154_v35 = vadd.f32 %v1092_v45, %v1000_v33 }
 0x165   : > { %2279 = vmatmul.msk.f32.gmra.mxu1 %vm360_vm2, %v2923_v61  ;;  %v1253_v59 = vpop.f32.mrf.mxu0 }
 0x166   : > { %v3422_v37 = vadd.f32 %v1250_v28, %v1154_v35  ;;  %2312 = vmatmul.msk.f32.gmra.mxu2 %vm360_vm2, %v2803_v60 }
 0x167   : > { %2345 = vmatmul.msk.f32.gmra.mxu3 %vm360_vm2, %v2841_v12 }
 0x168   : > { %2378 = vmatmul.msk.f32.gmra.mxu0 %vm360_vm2, %v2948_v63 }
 0x169   : > { %v941_v25 = vpop.f32.mrf.mxu2 }
 0x16a   : > { %v1095_v43 = vpop.f32.mrf.mxu3  ;;  %v1001_v36 = vadd.f32 %v941_v25, %v681_v29  ;;  %v683_v1 = vpop.f32.mrf.mxu1 }
 0x16b   : > { %v684_v12 = vadd.f32 %v683_v1, %v3050_v16  ;;  %v3950_v16 = vld [vmem:[#allocation34_spill] sm:$0xff] }
 0x16c   : > { %v1155_v3 = vadd.f32 %v1095_v43, %v1001_v36 }
 0x16d   : > { %2280 = vmatmul.msk.f32.gmra.mxu1 %vm360_vm2, %v2935_v44  ;;  %v1256_v61 = vpop.f32.mrf.mxu0 }
 0x16e   : > { %v3433_v5 = vadd.f32 %v1253_v59, %v1155_v3  ;;  %2313 = vmatmul.msk.f32.gmra.mxu2 %vm360_vm2, %v2806_v32  ;;  %v2423_v32 = vld [vmem:[%s2512_s27 + $0x60] sm:$0xff]  ;;  %v3953_v59 = vld [vmem:[#allocation36_spill] sm:$0xff] }
 0x16f   : > { %2346 = vmatmul.msk.f32.gmra.mxu3 %vm360_vm2, %v2868_v24 }
 0x170   : > { %2379 = vmatmul.msk.f32.gmra.mxu0 %vm360_vm2, %v2960_v55 }
 0x171   : > { %v944_v60 = vpop.f32.mrf.mxu2 }
 0x172   : > { %v1098_v40 = vpop.f32.mrf.mxu3  ;;  %v1002_v53 = vadd.f32 %v944_v60, %v684_v12  ;;  %v686_v6 = vpop.f32.mrf.mxu1  ;;  %v3954_v12 = vld [vmem:[#allocation12_spill] sm:$0xff] }
 0x173   : > { %v687_v24 = vadd.f32 %v686_v6, %v3070_v42  ;;  %v3952_v42 = vld [vmem:[#allocation45_spill] sm:$0xff]  ;;  %v3955_v60 = vld [vmem:[#allocation48_spill] sm:$0xff] }
 0x174   : > { %v1156_v30 = vadd.f32 %v1098_v40, %v1002_v53  ;;  %v3956_v53 = vld [vmem:[#allocation38_spill] sm:$0xff] }
 0x175   : > { %2281 = vmatmul.msk.f32.gmra.mxu1 %vm360_vm2, %v2948_v63  ;;  %v1259_v44 = vpop.f32.mrf.mxu0 }
 0x176   : > { %v3444_v52 = vadd.f32 %v1256_v61, %v1156_v30  ;;  %2314 = vmatmul.msk.f32.gmra.mxu2 %vm360_vm2, %v2423_v32  ;;  %v2425_v61 = vld [vmem:[%s2512_s27 + $0x78] sm:$0xff] }
 0x177   : > { %2347 = vmatmul.msk.f32.gmra.mxu3 %vm360_vm2, %v2545_v19  ;;  %v3951_v19 = vld [vmem:[#allocation7_spill] sm:$0xff] }
 0x178   : > { %2380 = vmatmul.msk.f32.gmra.mxu0 %vm360_vm2, %v3950_v16 }
 0x179   : > { %v947_v56 = vpop.f32.mrf.mxu2 }
 0x17a   : > { %v1101_v28 = vpop.f32.mrf.mxu3  ;;  %v1003_v27 = vadd.f32 %v947_v56, %v687_v24  ;;  %v689_v62 = vpop.f32.mrf.mxu1 }
 0x17b   : > { %v690_v35 = vadd.f32 %v689_v62, %v3952_v42  ;;  %v3958_v62 = vld [vmem:[#allocation51_spill] sm:$0xff] }
 0x17c   : > { %v1157_v63 = vadd.f32 %v1101_v28, %v1003_v27  ;;  %v2426_v28 = vld [vmem:[%s2512_s27 + $0x80] sm:$0xff]  ;;  %v3957_v27 = vld [vmem:[#allocation15_spill] sm:$0xff] }
 0x17d   : > { %2282 = vmatmul.msk.f32.gmra.mxu1 %vm360_vm2, %v2960_v55  ;;  %v1262_v45 = vpop.f32.mrf.mxu0 }
 0x17e   : > { %v3455_v33 = vadd.f32 %v1259_v44, %v1157_v63  ;;  %2315 = vmatmul.msk.f32.gmra.mxu2 %vm360_vm2, %v2424_v47 }
 0x17f   : > { %2348 = vmatmul.msk.f32.gmra.mxu3 %vm360_vm2, %v3951_v19 }
 0x180   : > { %2381 = vmatmul.msk.f32.gmra.mxu0 %vm360_vm2, %v3953_v59 }
 0x181   : > { %v950_v29 = vpop.f32.mrf.mxu2 }
 0x182   : > { %v1104_v25 = vpop.f32.mrf.mxu3  ;;  %v1004_v43 = vadd.f32 %v950_v29, %v690_v35  ;;  %v692_v36 = vpop.f32.mrf.mxu1 }
 0x183   : > { %v693_v40 = vadd.f32 %v692_v36, %v3955_v60  ;;  %v3960_v36 = vld [vmem:[#allocation19_spill] sm:$0xff] }
 0x184   : > { %v1158_v55 = vadd.f32 %v1104_v25, %v1004_v43  ;;  %v2427_v43 = vld [vmem:[%s2512_s27 + $0x90] sm:$0xff] }
 0x185   : > { %2283 = vmatmul.msk.f32.gmra.mxu1 %vm360_vm2, %v3950_v16  ;;  %v1265_v1 = vpop.f32.mrf.mxu0 }
 0x186   : > { %v3466_v3 = vadd.f32 %v1262_v45, %v1158_v55  ;;  %2316 = vmatmul.msk.f32.gmra.mxu2 %vm360_vm2, %v2425_v61  ;;  %v3959_v45 = vld [vmem:[#allocation40_spill] sm:$0xff]  ;;  %v3961_v55 = vld [vmem:[#allocation35_spill] sm:$0xff]  ;;  %v3962_v61 = vld [vmem:[#allocation42_spill] sm:$0xff] }
 0x187   : > { %2349 = vmatmul.msk.f32.gmra.mxu3 %vm360_vm2, %v3954_v12 }
 0x188   : > { %2382 = vmatmul.msk.f32.gmra.mxu0 %vm360_vm2, %v3956_v53 }
 0x189   : > { %v953_v6 = vpop.f32.mrf.mxu2 }
 0x18a   : > { %v1107_v30 = vpop.f32.mrf.mxu3  ;;  %v1005_v44 = vadd.f32 %v953_v6, %v693_v40  ;;  %v695_v32 = vpop.f32.mrf.mxu1 }
 0x18b   : > { %v696_v63 = vadd.f32 %v695_v32, %v3958_v62  ;;  %v2428_v32 = vld [vmem:[%s2512_s27 + $0x98] sm:$0xff] }
 0x18c   : > { %v1159_v24 = vadd.f32 %v1107_v30, %v1005_v44 }
 0x18d   : > { %2284 = vmatmul.msk.f32.gmra.mxu1 %vm360_vm2, %v3953_v59  ;;  %v1268_v16 = vpop.f32.mrf.mxu0 }
 0x18e   : > { %v3477_v56 = vadd.f32 %v1265_v1, %v1159_v24  ;;  %2317 = vmatmul.msk.f32.gmra.mxu2 %vm360_vm2, %v2426_v28  ;;  %v3963_v24 = vld [vmem:[#allocation23_spill] sm:$0xff] }
 0x18f   : > { %2350 = vmatmul.msk.f32.gmra.mxu3 %vm360_vm2, %v3957_v27  ;;  %v3965_v27 = vld [vmem:[#allocation44_spill] sm:$0xff] }
 0x190   : > { %2383 = vmatmul.msk.f32.gmra.mxu0 %vm360_vm2, %v3959_v45 }
 0x191   : > { %v956_v47 = vpop.f32.mrf.mxu2 }
 0x192   : > { %v1110_v19 = vpop.f32.mrf.mxu3  ;;  %v1006_v42 = vadd.f32 %v956_v47, %v696_v63  ;;  %v698_v35 = vpop.f32.mrf.mxu1 }
 0x193   : > { %v699_v1 = vadd.f32 %v698_v35, %v3961_v55  ;;  %v3968_v55 = vld [vmem:[#allocation47_spill] sm:$0xff] }
 0x194   : > { %v1160_v59 = vadd.f32 %v1110_v19, %v1006_v42 }
 0x195   : > { %2285 = vmatmul.msk.f32.gmra.mxu1 %vm360_vm2, %v3956_v53  ;;  %v1271_v29 = vpop.f32.mrf.mxu0 }
 0x196   : > { %v3488_v25 = vadd.f32 %v1268_v16, %v1160_v59  ;;  %2318 = vmatmul.msk.f32.gmra.mxu2 %vm360_vm2, %v2427_v43  ;;  %v3964_v16 = vld [vmem:[#allocation37_spill] sm:$0xff]  ;;  %v2429_v59 = vld [vmem:[%s2512_s27 + $0xa8] sm:$0xff] }
 0x197   : > { %2351 = vmatmul.msk.f32.gmra.mxu3 %vm360_vm2, %v3960_v36  ;;  %v3967_v43 = vld [vmem:[#allocation39_spill] sm:$0xff] }
 0x198   : > { %2384 = vmatmul.msk.f32.gmra.mxu0 %vm360_vm2, %v3962_v61 }
 0x199   : > { %v959_v12 = vpop.f32.mrf.mxu2 }
 0x19a   : > { %v1113_v60 = vpop.f32.mrf.mxu3  ;;  %v1007_v40 = vadd.f32 %v959_v12, %v699_v1  ;;  %v701_v6 = vpop.f32.mrf.mxu1 }
 0x19b   : > { %v702_v28 = vadd.f32 %v701_v6, %v3964_v16 }
 0x19c   : > { %v1161_v53 = vadd.f32 %v1113_v60, %v1007_v40 }
 0x19d   : > { %2286 = vmatmul.msk.f32.gmra.mxu1 %vm360_vm2, %v3959_v45  ;;  %v1274_v30 = vpop.f32.mrf.mxu0 }
 0x19e   : > { %v3499_v44 = vadd.f32 %v1271_v29, %v1161_v53  ;;  %2319 = vmatmul.msk.f32.gmra.mxu2 %vm360_vm2, %v2428_v32  ;;  %v3966_v29 = vld [vmem:[#allocation28_spill] sm:$0xff] }
 0x19f   : > { %2352 = vmatmul.msk.f32.gmra.mxu3 %vm360_vm2, %v3963_v24  ;;  %v3969_v32 = vld [vmem:[#allocation32_spill] sm:$0xff]  ;;  %v3970_v24 = vld [vmem:[#allocation41_spill] sm:$0xff] }
 0x1a0   : > { %2385 = vmatmul.msk.f32.gmra.mxu0 %vm360_vm2, %v3965_v27 }
 0x1a1   : > { %v962_v62 = vpop.f32.mrf.mxu2 }
 0x1a2   : > { %v1116_v63 = vpop.f32.mrf.mxu3  ;;  %v1008_v47 = vadd.f32 %v962_v62, %v702_v28  ;;  %v704_v19 = vpop.f32.mrf.mxu1  ;;  %v3971_v28 = vld [vmem:[#allocation50_spill] sm:$0xff] }
 0x1a3   : > { %v705_v36 = vadd.f32 %v704_v19, %v3967_v43  ;;  %v3973_v43 = vld [vmem:[#allocation43_spill] sm:$0xff] }
 0x1a4   : > { %v1162_v45 = vadd.f32 %v1116_v63, %v1008_v47 }
 0x1a5   : > { %2287 = vmatmul.msk.f32.gmra.mxu1 %vm360_vm2, %v3962_v61  ;;  %v1277_v42 = vpop.f32.mrf.mxu0 }
 0x1a6   : > { %v3510_v35 = vadd.f32 %v1274_v30, %v1162_v45  ;;  %2320 = vmatmul.msk.f32.gmra.mxu2 %vm360_vm2, %v2429_v59  ;;  %v2430_v30 = vld [vmem:[%s2512_s27 + $0xb0] sm:$0xff]  ;;  %v2431_v59 = vld [vmem:[%s2512_s27 + $0xc0] sm:$0xff] }
 0x1a7   : > { %2353 = vmatmul.msk.f32.gmra.mxu3 %vm360_vm2, %v3966_v29  ;;  %v3972_v29 = vld [vmem:[#allocation4_spill] sm:$0xff] }
 0x1a8   : > { %2386 = vmatmul.msk.f32.gmra.mxu0 %vm360_vm2, %v3968_v55 }
 0x1a9   : > { %v965_v1 = vpop.f32.mrf.mxu2 }
 0x1aa   : > { %v1119_v12 = vpop.f32.mrf.mxu3  ;;  %v1009_v60 = vadd.f32 %v965_v1, %v705_v36  ;;  %v707_v40 = vpop.f32.mrf.mxu1  ;;  %v3974_v1 = vld [vmem:[#allocation53_spill] sm:$0xff] }
 0x1ab   : > { %v708_v16 = vadd.f32 %v707_v40, %v3970_v24  ;;  %v3975_v24 = vld [vmem:[#allocation8_spill] sm:$0xff] }
 0x1ac   : > { %v1163_v61 = vadd.f32 %v1119_v12, %v1009_v60 }
 0x1ad   : > { %2288 = vmatmul.msk.f32.gmra.mxu1 %vm360_vm2, %v3965_v27  ;;  %v1280_v6 = vpop.f32.mrf.mxu0 }
 0x1ae   : > { %v3521_v53 = vadd.f32 %v1277_v42, %v1163_v61  ;;  %2321 = vmatmul.msk.f32.gmra.mxu2 %vm360_vm2, %v2430_v30 }
 0x1af   : > { %2354 = vmatmul.msk.f32.gmra.mxu3 %vm360_vm2, %v3969_v32  ;;  %v2432_v32 = vld [vmem:[%s2512_s27 + $0xc8] sm:$0xff] }
 0x1b0   : > { %2387 = vmatmul.msk.f32.gmra.mxu0 %vm360_vm2, %v3971_v28 }
 0x1b1   : > { %v968_v62 = vpop.f32.mrf.mxu2 }
 0x1b2   : > { %v1122_v63 = vpop.f32.mrf.mxu3  ;;  %v1010_v47 = vadd.f32 %v968_v62, %v708_v16  ;;  %v710_v19 = vpop.f32.mrf.mxu1  ;;  %v3976_v16 = vld [vmem:[#allocation46_spill] sm:$0xff] }
 0x1b3   : > { %v711_v36 = vadd.f32 %v710_v19, %v3973_v43  ;;  %v3977_v43 = vld [vmem:[#allocation49_spill] sm:$0xff] }
 0x1b4   : > { %v1164_v27 = vadd.f32 %v1122_v63, %v1010_v47 }
 0x1b5   : > { %2289 = vmatmul.msk.f32.gmra.mxu1 %vm360_vm2, %v3968_v55  ;;  %v1283_v45 = vpop.f32.mrf.mxu0 }
 0x1b6   : > { %v3532_v42 = vadd.f32 %v1280_v6, %v1164_v27  ;;  %2322 = vmatmul.msk.f32.gmra.mxu2 %vm360_vm2, %v2431_v59 }
 0x1b7   : > { %2355 = vmatmul.msk.f32.gmra.mxu3 %vm360_vm2, %v3972_v29  ;;  %v2433_v29 = vld [vmem:[%s2512_s27 + $0xd8] sm:$0xff] }
 0x1b8   : > { %2388 = vmatmul.msk.f32.gmra.mxu0 %vm360_vm2, %v3974_v1 }
 0x1b9   : > { %v971_v12 = vpop.f32.mrf.mxu2 }
 0x1ba   : > { %v1125_v60 = vpop.f32.mrf.mxu3  ;;  %v1011_v40 = vadd.f32 %v971_v12, %v711_v36  ;;  %v713_v61 = vpop.f32.mrf.mxu1 }
 0x1bb   : > { %v714_v62 = vadd.f32 %v713_v61, %v3976_v16 }
 0x1bc   : > { %v1165_v55 = vadd.f32 %v1125_v60, %v1011_v40 }
 0x1bd   : > { %2290 = vmatmul.msk.f32.gmra.mxu1 %vm360_vm2, %v3971_v28  ;;  %v1286_v6 = vpop.f32.mrf.mxu0 }
 0x1be   : > { %v3543_v30 = vadd.f32 %v1283_v45, %v1165_v55  ;;  %2323 = vmatmul.msk.f32.gmra.mxu2 %vm360_vm2, %v2432_v32  ;;  %v2434_v32 = vld [vmem:[%s2512_s27 + $0xe0] sm:$0xff] }
 0x1bf   : > { %2356 = vmatmul.msk.f32.gmra.mxu3 %vm360_vm2, %v3975_v24 }
 0x1c0   : > { %2389 = vmatmul.msk.f32.gmra.mxu0 %vm360_vm2, %v3150_v7 }
 0x1c1   : > { %v974_v63 = vpop.f32.mrf.mxu2 }
 0x1c2   : > { %v1128_v47 = vpop.f32.mrf.mxu3  ;;  %v1012_v19 = vadd.f32 %v974_v63, %v714_v62  ;;  %v716_v27 = vpop.f32.mrf.mxu1 }
 0x1c3   : > { %v717_v36 = vadd.f32 %v716_v27, %v3977_v43 }
 0x1c4   : > { %v1166_v28 = vadd.f32 %v1128_v47, %v1012_v19 }
 0x1c5   : > { %2291 = vmatmul.msk.f32.gmra.mxu1 %vm360_vm2, %v3974_v1  ;;  %v1289_v45 = vpop.f32.mrf.mxu0 }
 0x1c6   : > { %v3554_v59 = vadd.f32 %v1286_v6, %v1166_v28  ;;  %2324 = vmatmul.msk.f32.gmra.mxu2 %vm360_vm2, %v2433_v29  ;;  %v2435_v28 = vld [vmem:[%s2512_s27 + $0xf0] sm:$0xff] }
 0x1c7   : > { %2357 = vmatmul.msk.f32.gmra.mxu3 %vm360_vm2, %v2632_v54  ;;  %v3978_v54 = vld [vmem:[#allocation52_spill] sm:$0xff] }
 0x1c8   : > { %2390 = vmatmul.msk.f32.gmra.mxu0 %vm360_vm2, %v3166_v0 }
 0x1c9   : > { %v977_v12 = vpop.f32.mrf.mxu2 }
 0x1ca   : > { %v1131_v60 = vpop.f32.mrf.mxu3  ;;  %v1013_v40 = vadd.f32 %v977_v12, %v717_v36  ;;  %v719_v61 = vpop.f32.mrf.mxu1 }
 0x1cb   : > { %v720_v24 = vadd.f32 %v719_v61, %v3978_v54 }
 0x1cc   : > { %v1167_v1 = vadd.f32 %v1131_v60, %v1013_v40  ;;  %v2436_v40 = vld [vmem:[%s2512_s27 + $0xf8] sm:$0xff] }
 0x1cd   : > { %2292 = vmatmul.msk.f32.gmra.mxu1 %vm360_vm2, %v3150_v7  ;;  %v1292_v55 = vpop.f32.mrf.mxu0 }
 0x1ce   : > { %v3565_v6 = vadd.f32 %v1289_v45, %v1167_v1  ;;  %2325 = vmatmul.msk.f32.gmra.mxu2 %vm360_vm2, %v2434_v32 }
 0x1cf   : > { %2358 = vmatmul.msk.f32.gmra.mxu3 %vm360_vm2, %v2668_v2 }
 0x1d0   : > { %2391 = vmatmul.msk.f32.gmra.mxu0 %vm360_vm2, %v3181_v23 }
 0x1d1   : > { %v980_v16 = vpop.f32.mrf.mxu2 }
 0x1d2   : > { %v1134_v62 = vpop.f32.mrf.mxu3  ;;  %v1014_v63 = vadd.f32 %v980_v16, %v720_v24  ;;  %v1356_v47 = vpop.f32.mrf.mxu1  ;;  %v2437_v24 = vld [vmem:[%s2512_s27 + $0x108] sm:$0xff] }
 0x1d3   : > { %v1452_v2 = vadd.f32 %v1356_v47, %v3154_v18 }
 0x1d4   : > { %v1168_v7 = vadd.f32 %v1134_v62, %v1014_v63 }
 0x1d5   : > { %2293 = vmatmul.msk.f32.gmra.mxu1 %vm360_vm2, %v3166_v0  ;;  %v1825_v19 = vpop.f32.mrf.mxu0 }
 0x1d6   : > { %v3576_v27 = vadd.f32 %v1292_v55, %v1168_v7  ;;  %2326 = vmatmul.msk.f32.gmra.mxu2 %vm360_vm2, %v2435_v28 }
 0x1d7   : > { %2359 = vmatmul.msk.f32.gmra.mxu3 %vm360_vm2, %v2723_v49 }
 0x1d8   : > { %2392 = vmatmul.msk.f32.gmra.mxu0 %vm360_vm2, %v3197_v26 }
 0x1d9   : > { %v1510_v45 = vpop.f32.mrf.mxu2 }
 0x1da   : > { %v1668_v29 = vpop.f32.mrf.mxu3  ;;  %v1606_v43 = vadd.f32 %v1510_v45, %v1452_v2  ;;  %v1359_v36 = vpop.f32.mrf.mxu1 }
 0x1db   : > { %v1453_v49 = vadd.f32 %v1359_v36, %v3170_v22 }
 0x1dc   : > { %v1764_v0 = vadd.f32 %v1668_v29, %v1606_v43  ;;  %v2438_v43 = vld [vmem:[%s2512_s27 + $0x110] sm:$0xff] }
 0x1dd   : > { %2294 = vmatmul.msk.f32.gmra.mxu1 %vm360_vm2, %v3181_v23  ;;  %v1828_v12 = vpop.f32.mrf.mxu0  ;;  %v3597_v23 = vld [vmem:[%s3784_s2] ss:$0 sm:$0xff] }
 0x1de   : > { %v1921_v60 = vadd.f32 %v1825_v19, %v1764_v0  ;;  %2327 = vmatmul.msk.f32.gmra.mxu2 %vm360_vm2, %v2436_v40 }
 0x1df   : > { %2360 = vmatmul.msk.f32.gmra.mxu3 %vm360_vm2, %v2768_v58 }
 0x1e0   : > { %2393 = vmatmul.msk.f32.gmra.mxu0 %vm360_vm2, %v3212_v10  ;;  %v1956_v58 = vadd.f32 %v3597_v23, %v1921_v60 }
 0x1e1   : > { %v1513_v18 = vpop.f32.mrf.mxu2 }
 0x1e2   : > { %v1671_v61 = vpop.f32.mrf.mxu3  ;;  %v1607_v1 = vadd.f32 %v1513_v18, %v1453_v49  ;;  %v1362_v55 = vpop.f32.mrf.mxu1  ;;  %v1988_v47 = vmax.f32 %v1956_v58, 0.0 }
 0x1e3   : > { %v1454_v16 = vadd.f32 %v1362_v55, %v3185_v48  ;;  %v3979_v48 = vld [vmem:[#allocation54_spill] sm:$0xff] }
 0x1e4   : > { %v1765_v32 = vadd.f32 %v1671_v61, %v1607_v1 }
 0x1e5   : > { %2295 = vmatmul.msk.f32.gmra.mxu1 %vm360_vm2, %v3197_v26  ;;  %v1831_v54 = vpop.f32.mrf.mxu0 }
 0x1e6   : > { %v1922_v22 = vadd.f32 %v1828_v12, %v1765_v32  ;;  %2328 = vmatmul.msk.f32.gmra.mxu2 %vm360_vm2, %v2437_v24  ;;  %v3980_v32 = vld [vmem:[#allocation21_spill] sm:$0xff] }
 0x1e7   : > { %2361 = vmatmul.msk.f32.gmra.mxu3 %vm360_vm2, %v3915_v17 }
 0x1e8   : > { %v1957_v62 = vadd.f32 %v3597_v23, %v1922_v22  ;;  %2394 = vmatmul.msk.f32.gmra.mxu0 %vm360_vm2, %v3228_v57  ;;  %v3981_v22 = vld [vmem:[#allocation2_spill] sm:$0xff] }
 0x1e9   : > { %v1516_v63 = vpop.f32.mrf.mxu2 }
 0x1ea   : > { %v1674_v26 = vpop.f32.mrf.mxu3  ;;  %v1989_v7 = vmax.f32 %v1957_v62, 0.0  ;;  %v1608_v19 = vadd.f32 %v1516_v63, %v1454_v16  ;;  %v1365_v28 = vpop.f32.mrf.mxu1 }
 0x1eb   : > { %v1455_v36 = vadd.f32 %v1365_v28, %v3979_v48  ;;  %v3982_v28 = vld [vmem:[#allocation9_spill] sm:$0xff] }
 0x1ec   : > { %v2020_v2 = vadd.f32 %v1989_v7, %v1988_v47  ;;  %v1766_v45 = vadd.f32 %v1674_v26, %v1608_v19 }
 0x1ed   : > { %2296 = vmatmul.msk.f32.gmra.mxu1 %vm360_vm2, %v3212_v10  ;;  %v1834_v29 = vpop.f32.mrf.mxu0 }
 0x1ee   : > { %v1923_v17 = vadd.f32 %v1831_v54, %v1766_v45  ;;  %2329 = vmatmul.msk.f32.gmra.mxu2 %vm360_vm2, %v2438_v43 }
 0x1ef   : > { %2362 = vmatmul.msk.f32.gmra.mxu3 %vm360_vm2, %v2860_v13  ;;  %v2439_v13 = vld [vmem:[%s2512_s27 + $0x120] sm:$0xff] }
 0x1f0   : > { %v1958_v0 = vadd.f32 %v3597_v23, %v1923_v17  ;;  %2395 = vmatmul.msk.f32.gmra.mxu0 %vm360_vm2, %v3243_v51 }
 0x1f1   : > { %v1519_v12 = vpop.f32.mrf.mxu2 }
 0x1f2   : > { %v1677_v60 = vpop.f32.mrf.mxu3  ;;  %v1990_v40 = vmax.f32 %v1958_v0, 0.0  ;;  %v1609_v10 = vadd.f32 %v1519_v12, %v1455_v36  ;;  %v1368_v49 = vpop.f32.mrf.mxu1 }
 0x1f3   : > { %v1456_v54 = vadd.f32 %v1368_v49, %v3980_v32  ;;  %v3984_v49 = vld [vmem:[#allocation25_spill] sm:$0xff] }
 0x1f4   : > { %v2021_v18 = vadd.f32 %v2020_v2, %v1990_v40  ;;  %v1767_v61 = vadd.f32 %v1677_v60, %v1609_v10  ;;  %v3983_v2 = vld [vmem:[#allocation29_spill] sm:$0xff] }
 0x1f5   : > { %2297 = vmatmul.msk.f32.gmra.mxu1 %vm360_vm2, %v3228_v57  ;;  %v1837_v1 = vpop.f32.mrf.mxu0  ;;  %v2441_v10 = vld [vmem:[%s2512_s27 + $0x138] sm:$0xff] }
 0x1f6   : > { %v1924_v55 = vadd.f32 %v1834_v29, %v1767_v61  ;;  %2330 = vmatmul.msk.f32.gmra.mxu2 %vm360_vm2, %v2439_v13 }
 0x1f7   : > { %2363 = vmatmul.msk.f32.gmra.mxu3 %vm360_vm2, %v3921_v34  ;;  %v2440_v34 = vld [vmem:[%s2512_s27 + $0x128] sm:$0xff] }
 0x1f8   : > { %v1959_v58 = vadd.f32 %v3597_v23, %v1924_v55  ;;  %2396 = vmatmul.msk.f32.gmra.mxu0 %vm360_vm2, %v3981_v22 }
 0x1f9   : > { %v1522_v24 = vpop.f32.mrf.mxu2 }
 0x1fa   : > { %v1680_v16 = vpop.f32.mrf.mxu3  ;;  %v1991_v62 = vmax.f32 %v1959_v58, 0.0  ;;  %v1610_v57 = vadd.f32 %v1522_v24, %v1456_v54  ;;  %v1371_v63 = vpop.f32.mrf.mxu1 }
 0x1fb   : > { %v1457_v45 = vadd.f32 %v1371_v63, %v3983_v2  ;;  %v3987_v63 = vld [vmem:[#allocation31_spill] sm:$0xff]  ;;  %v3988_v2 = vld [vmem:[#allocation5_spill] sm:$0xff] }
 0x1fc   : > { %v2022_v26 = vadd.f32 %v2021_v18, %v1991_v62  ;;  %v1768_v47 = vadd.f32 %v1680_v16, %v1610_v57  ;;  %v3986_v57 = vld [vmem:[#allocation16_spill] sm:$0xff] }
 0x1fd   : > { %2298 = vmatmul.msk.f32.gmra.mxu1 %vm360_vm2, %v3243_v51  ;;  %v1840_v7 = vpop.f32.mrf.mxu0 }
 0x1fe   : > { %v1925_v19 = vadd.f32 %v1837_v1, %v1768_v47  ;;  %2331 = vmatmul.msk.f32.gmra.mxu2 %vm360_vm2, %v2440_v34  ;;  %v3985_v1 = vld [vmem:[#allocation3_spill] sm:$0xff] }
 0x1ff   : > { %2364 = vmatmul.msk.f32.gmra.mxu3 %vm360_vm2, %v3982_v28 }
 0x200   : > { %v1960_v29 = vadd.f32 %v3597_v23, %v1925_v19  ;;  %2397 = vmatmul.msk.f32.gmra.mxu0 %vm360_vm2, %v3274_v39 }
 0x201   : > { %v1525_v17 = vpop.f32.mrf.mxu2 }
 0x202   : > { %v1683_v43 = vpop.f32.mrf.mxu3  ;;  %v1992_v48 = vmax.f32 %v1960_v29, 0.0  ;;  %v1611_v51 = vadd.f32 %v1525_v17, %v1457_v45  ;;  %v1374_v36 = vpop.f32.mrf.mxu1 }
 0x203   : > { %v1458_v18 = vadd.f32 %v1374_v36, %v3984_v49 }
 0x204   : > { %v2023_v0 = vadd.f32 %v2022_v26, %v1992_v48  ;;  %v1769_v12 = vadd.f32 %v1683_v43, %v1611_v51  ;;  %v2443_v51 = vld [vmem:[%s2512_s27 + $0x150] sm:$0xff] }
 0x205   : > { %2299 = vmatmul.msk.f32.gmra.mxu1 %vm360_vm2, %v3981_v22  ;;  %v1843_v60 = vpop.f32.mrf.mxu0 }
 0x206   : > { %v1926_v40 = vadd.f32 %v1840_v7, %v1769_v12  ;;  %2332 = vmatmul.msk.f32.gmra.mxu2 %vm360_vm2, %v2441_v10 }
 0x207   : > { %2365 = vmatmul.msk.f32.gmra.mxu3 %vm360_vm2, %v3929_v21  ;;  %v2442_v21 = vld [vmem:[%s2512_s27 + $0x140] sm:$0xff] }
 0x208   : > { %v1961_v61 = vadd.f32 %v3597_v23, %v1926_v40  ;;  %2398 = vmatmul.msk.f32.gmra.mxu0 %vm360_vm2, %v3985_v1 }
 0x209   : > { %v1528_v55 = vpop.f32.mrf.mxu2 }
 0x20a   : > { %v1686_v13 = vpop.f32.mrf.mxu3  ;;  %v1993_v32 = vmax.f32 %v1961_v61, 0.0  ;;  %v1612_v54 = vadd.f32 %v1528_v55, %v1458_v18  ;;  %v1377_v58 = vpop.f32.mrf.mxu1  ;;  %v3990_v18 = vld [vmem:[#allocation10_spill] sm:$0xff] }
 0x20b   : > { %v1459_v26 = vadd.f32 %v1377_v58, %v3987_v63 }
 0x20c   : > { %v2024_v22 = vadd.f32 %v2023_v0, %v1993_v32  ;;  %v1770_v24 = vadd.f32 %v1686_v13, %v1612_v54  ;;  %v3989_v0 = vld [vmem:[#allocation13_spill] sm:$0xff]  ;;  %v3991_v54 = vld [vmem:[#allocation24_spill] sm:$0xff] }
 0x20d   : > { %2300 = vmatmul.msk.f32.gmra.mxu1 %vm360_vm2, %v3274_v39  ;;  %v1846_v16 = vpop.f32.mrf.mxu0 }
 0x20e   : > { %v1927_v62 = vadd.f32 %v1843_v60, %v1770_v24  ;;  %2333 = vmatmul.msk.f32.gmra.mxu2 %vm360_vm2, %v2442_v21 }
 0x20f   : > { %2366 = vmatmul.msk.f32.gmra.mxu3 %vm360_vm2, %v3986_v57 }
 0x210   : > { %v1962_v47 = vadd.f32 %v3597_v23, %v1927_v62  ;;  %2399 = vmatmul.msk.f32.gmra.mxu0 %vm360_vm2, %v3305_v20 }
 0x211   : > { %v1531_v7 = vpop.f32.mrf.mxu2 }
 0x212   : > { %v1689_v19 = vpop.f32.mrf.mxu3  ;;  %v1994_v34 = vmax.f32 %v1962_v47, 0.0  ;;  %v1613_v39 = vadd.f32 %v1531_v7, %v1459_v26  ;;  %v1380_v28 = vpop.f32.mrf.mxu1 }
 0x213   : > { %v1460_v45 = vadd.f32 %v1380_v28, %v3988_v2 }
 0x214   : > { %v2025_v29 = vadd.f32 %v2024_v22, %v1994_v34  ;;  %v1771_v17 = vadd.f32 %v1689_v19, %v1613_v39  ;;  %v2445_v19 = vld [vmem:[%s2512_s27 + $0x168] sm:$0xff]  ;;  %v3993_v34 = vld [vmem:[#allocation30_spill] sm:$0xff] }
 0x215   : > { %2301 = vmatmul.msk.f32.gmra.mxu1 %vm360_vm2, %v3985_v1  ;;  %v1849_v43 = vpop.f32.mrf.mxu0 }
 0x216   : > { %v1928_v48 = vadd.f32 %v1846_v16, %v1771_v17  ;;  %2334 = vmatmul.msk.f32.gmra.mxu2 %vm360_vm2, %v2443_v51 }
 0x217   : > { %2367 = vmatmul.msk.f32.gmra.mxu3 %vm360_vm2, %v3937_v50  ;;  %v2444_v50 = vld [vmem:[%s2512_s27 + $0x158] sm:$0xff] }
 0x218   : > { %v1963_v36 = vadd.f32 %v3597_v23, %v1928_v48  ;;  %2400 = vmatmul.msk.f32.gmra.mxu0 %vm360_vm2, %v3989_v0 }
 0x219   : > { %v1534_v12 = vpop.f32.mrf.mxu2 }
 0x21a   : > { %v1692_v60 = vpop.f32.mrf.mxu3  ;;  %v1995_v40 = vmax.f32 %v1963_v36, 0.0  ;;  %v1614_v10 = vadd.f32 %v1534_v12, %v1460_v45  ;;  %v1383_v49 = vpop.f32.mrf.mxu1 }
 0x21b   : > { %v1461_v61 = vadd.f32 %v1383_v49, %v3990_v18  ;;  %v3996_v49 = vld [vmem:[#allocation14_spill] sm:$0xff] }
 0x21c   : > { %v2026_v1 = vadd.f32 %v2025_v29, %v1995_v40  ;;  %v1772_v55 = vadd.f32 %v1692_v60, %v1614_v10  ;;  %v2446_v60 = vld [vmem:[%s2512_s27 + $0x170] sm:$0xff]  ;;  %v3995_v40 = vld [vmem:[#allocation33_spill] sm:$0xff]  ;;  %v1327_v18 = vrot.slane %v3996_v49, 2 }
 0x21d   : > { %2302 = vmatmul.msk.f32.gmra.mxu1 %vm360_vm2, %v3305_v20  ;;  %v1852_v13 = vpop.f32.mrf.mxu0  ;;  %v3992_v20 = vld [vmem:[#allocation6_spill] sm:$0xff] }
 0x21e   : > { %v1929_v32 = vadd.f32 %v1849_v43, %v1772_v55  ;;  %2335 = vmatmul.msk.f32.gmra.mxu2 %vm360_vm2, %v2444_v50  ;;  %v3994_v43 = vld [vmem:[#allocation11_spill] sm:$0xff]  ;;  %v3997_v50 = vld [vmem:[#allocation17_spill] sm:$0xff] }
 0x21f   : > { %2368 = vmatmul.msk.f32.gmra.mxu3 %vm360_vm2, %v3991_v54 }
 0x220   : > { %v1964_v58 = vadd.f32 %v3597_v23, %v1929_v32  ;;  %2401 = vmatmul.msk.f32.gmra.mxu0 %vm360_vm2, %v3336_v41 }
 0x221   : > { %v1537_v22 = vpop.f32.mrf.mxu2 }
 0x222   : > { %v1695_v24 = vpop.f32.mrf.mxu3  ;;  %v1996_v16 = vmax.f32 %v1964_v58, 0.0  ;;  %v1615_v62 = vadd.f32 %v1537_v22, %v1461_v61  ;;  %v1386_v21 = vpop.f32.mrf.mxu1  ;;  %v1328_v61 = vrot.slane %v3347_v38, 2 }
 0x223   : > { %v1462_v57 = vadd.f32 %v1386_v21, %v3992_v20 }
 0x224   : > { %v2027_v63 = vadd.f32 %v2026_v1, %v1996_v16  ;;  %v1773_v26 = vadd.f32 %v1695_v24, %v1615_v62  ;;  %v1329_v16 = vsel %vm722_vm3, %v1327_v18, %v1328_v61 }
 0x225   : > { %2303 = vmatmul.msk.f32.gmra.mxu1 %vm360_vm2, %v3989_v0  ;;  %v1855_v47 = vpop.f32.mrf.mxu0 }
 0x226   : > { %v1930_v7 = vadd.f32 %v1852_v13, %v1773_v26  ;;  %2336 = vmatmul.msk.f32.gmra.mxu2 %vm360_vm2, %v2445_v19 }
 0x227   : > { %2369 = vmatmul.msk.f32.gmra.mxu3 %vm360_vm2, %v3993_v34 }
 0x228   : > { %v1965_v39 = vadd.f32 %v3597_v23, %v1930_v7  ;;  %2402 = vmatmul.msk.f32.gmra.mxu0 %vm360_vm2, %v3360_v4  ;;  %v3998_v7 = vld [vmem:[#allocation20_spill] sm:$0xff] }
 0x229   : > { %v1540_v28 = vpop.f32.mrf.mxu2 }
 0x22a   : > { %v1698_v2 = vpop.f32.mrf.mxu3  ;;  %v1997_v45 = vmax.f32 %v1965_v39, 0.0  ;;  %v1616_v29 = vadd.f32 %v1540_v28, %v1462_v57  ;;  %v1389_v17 = vpop.f32.mrf.mxu1  ;;  %v228_v28 = vld [vmem:[%s2512_s27 + $0x198] sm:$0xff] }
 0x22b   : > { %v1463_v48 = vadd.f32 %v1389_v17, %v3994_v43 }
 0x22c   : > { %v2028_v51 = vadd.f32 %v2027_v63, %v1997_v45  ;;  %v1774_v36 = vadd.f32 %v1698_v2, %v1616_v29  ;;  %v229_v2 = vld [vmem:[%s2512_s27 + $0x1a0] sm:$0xff] }
 0x22d   : > { %2304 = vmatmul.msk.f32.gmra.mxu1 %vm360_vm2, %v3336_v41  ;;  %v1858_v0 = vpop.f32.mrf.mxu0  ;;  %v1640_v17 = vrot.slane %v229_v2, 1 }
 0x22e   : > { %v1931_v12 = vadd.f32 %v1855_v47, %v1774_v36  ;;  %2337 = vmatmul.msk.f32.gmra.mxu2 %vm360_vm2, %v2446_v60  ;;  %v1797_v36 = vrot.slane %v229_v2, 2 }
 0x22f   : > { %2370 = vmatmul.msk.f32.gmra.mxu3 %vm360_vm2, %v3995_v40 }
 0x230   : > { %v1966_v10 = vadd.f32 %v3597_v23, %v1931_v12  ;;  %2403 = vmatmul.msk.f32.gmra.mxu0 %vm360_vm2, %v3382_v46 }
 0x231   : > { %v1543_v1 = vpop.f32.mrf.mxu2 }
 0x232   : > { %v1701_v55 = vpop.f32.mrf.mxu3  ;;  %v1998_v41 = vmax.f32 %v1966_v10, 0.0  ;;  %v1617_v13 = vadd.f32 %v1543_v1, %v1463_v48  ;;  %v1392_v32 = vpop.f32.mrf.mxu1 }
 0x233   : > { %v1464_v54 = vadd.f32 %v1392_v32, %v3997_v50 }
 0x234   : > { %v2029_v58 = vadd.f32 %v2028_v51, %v1998_v41  ;;  %v1775_v22 = vadd.f32 %v1701_v55, %v1617_v13 }
 0x235   : > { %2305 = vmatmul.msk.f32.gmra.mxu1 %vm360_vm2, %v3360_v4  ;;  %v1861_v24 = vpop.f32.mrf.mxu0  ;;  %v1330_v4 = vrot.slane %v3374_v14, 2  ;;  %v1639_v14 = vrot.slane %v228_v28, 1 }
 0x236   : > { %v1932_v62 = vadd.f32 %v1858_v0, %v1775_v22  ;;  %2338 = vmatmul.msk.f32.gmra.mxu2 %vm360_vm2, %v3996_v49  ;;  %v230_v49 = vld [vmem:[%s2512_s27 + $0x1a8] sm:$0x3] }
 0x237   : > { %2371 = vmatmul.msk.f32.gmra.mxu3 %vm360_vm2, %v3365_v11  ;;  %v1331_v45 = vsel %vm722_vm3, %v1328_v61, %v1330_v4  ;;  %v1642_v55 = vrot.slane %v230_v49, 1  ;;  %v1799_v32 = vrot.slane %v230_v49, 2 }
 0x238   : > { %v1967_v21 = vadd.f32 %v3597_v23, %v1932_v62  ;;  %2404 = vmatmul.msk.f32.gmra.mxu0 %vm360_vm2, %v1329_v16 }
 0x239   : > { %v1546_v20 = vpop.f32.mrf.mxu2 }
 0x23a   : > { %v1704_v57 = vpop.f32.mrf.mxu3  ;;  %v1999_v63 = vmax.f32 %v1967_v21, 0.0  ;;  %v1618_v26 = vadd.f32 %v1546_v20, %v1464_v54  ;;  %v1395_v47 = vpop.f32.mrf.mxu1  ;;  %v1800_v20 = vsel %vm722_vm3, %v1797_v36, %v1799_v32 }
 0x23b   : > { %v1465_v19 = vadd.f32 %v1395_v47, %v3998_v7 }
 0x23c   : > { %v2030_v34 = vadd.f32 %v2029_v58, %v1999_v63  ;;  %v1776_v39 = vadd.f32 %v1704_v57, %v1618_v26 }
 0x23d   : > { %2306 = vmatmul.msk.f32.gmra.mxu1 %vm360_vm2, %v3382_v46  ;;  %v1864_v11 = vpop.f32.mrf.mxu0  ;;  %v1796_v46 = vrot.slane %v228_v28, 2 }
 0x23e   : > { %v1933_v29 = vadd.f32 %v1861_v24, %v1776_v39  ;;  %2339 = vmatmul.msk.f32.gmra.mxu2 %vm360_vm2, %v3347_v38  ;;  %v1641_v38 = vsel %vm279_vm1, %v1639_v14, %v1640_v17  ;;  %v1643_v24 = vsel %vm279_vm1, %v1640_v17, %v1642_v55 }
 0x23f   : > { %2372 = vmatmul.msk.f32.gmra.mxu3 %vm360_vm2, %v3387_v15  ;;  %v1798_v61 = vsel %vm722_vm3, %v1796_v46, %v1797_v36 }
 0x240   : > { %v1968_v43 = vadd.f32 %v3597_v23, %v1933_v29  ;;  %2405 = vmatmul.msk.f32.gmra.mxu0 %vm360_vm2, %v1331_v45 }
 0x241   : > { %v1549_v48 = vpop.f32.mrf.mxu2 }
 0x242   : > { %v1707_v51 = vpop.f32.mrf.mxu3  ;;  %v2000_v0 = vmax.f32 %v1968_v43, 0.0  ;;  %v1619_v12 = vadd.f32 %v1549_v48, %v1465_v19  ;;  %v1398_v60 = vpop.f32.mrf.mxu1 }
 0x243   : > { %v1466_v40 = vadd.f32 %v1398_v60, %v3389_v8 }
 0x244   : > { %v2031_v10 = vadd.f32 %v2030_v34, %v2000_v0  ;;  %v1777_v15 = vadd.f32 %v1707_v51, %v1619_v12 }
 0x245   : > { %2307 = vmatmul.msk.f32.gmra.mxu1 %vm360_vm2, %v1329_v16  ;;  %v1867_v18 = vpop.f32.mrf.mxu0 }
 0x246   : > { %v1934_v1 = vadd.f32 %v1864_v11, %v1777_v15  ;;  %2340 = vmatmul.msk.f32.gmra.mxu2 %vm360_vm2, %v228_v28 }
 0x247   : > { %2373 = vmatmul.msk.f32.gmra.mxu3 %vm360_vm2, %v1641_v38 }
 0x248   : > { %v1969_v41 = vadd.f32 %v3597_v23, %v1934_v1  ;;  %2406 = vmatmul.msk.f32.gmra.mxu0 %vm360_vm2, %v1798_v61 }
 0x249   : > { %v1552_v8 = vpop.f32.mrf.mxu2 }
 0x24a   : > { %v1710_v13 = vpop.f32.mrf.mxu3  ;;  %v2001_v50 = vmax.f32 %v1969_v41, 0.0  ;;  %v1620_v54 = vadd.f32 %v1552_v8, %v1466_v40  ;;  %v1401_v58 = vpop.f32.mrf.mxu1 }
 0x24b   : > { %v1467_v22 = vadd.f32 %v1401_v58, %v3400_v31 }
 0x24c   : > { %v2032_v16 = vadd.f32 %v2031_v10, %v2001_v50  ;;  %v1778_v62 = vadd.f32 %v1710_v13, %v1620_v54 }
 0x24d   : > { %2308 = vmatmul.msk.f32.gmra.mxu1 %vm360_vm2, %v1331_v45  ;;  %v1870_v21 = vpop.f32.mrf.mxu0 }
 0x24e   : > { %v1935_v57 = vadd.f32 %v1867_v18, %v1778_v62  ;;  %2341 = vmatmul.msk.f32.gmra.mxu2 %vm360_vm2, %v229_v2 }
 0x24f   : > { %2374 = vmatmul.msk.f32.gmra.mxu3 %vm360_vm2, %v1643_v24 }
 0x250   : > { %v1970_v4 = vadd.f32 %v3597_v23, %v1935_v57  ;;  %2407 = vmatmul.msk.f32.gmra.mxu0 %vm360_vm2, %v1800_v20 }
 0x251   : > { %v1555_v63 = vpop.f32.mrf.mxu2 }
 0x252   : > { %v1713_v31 = vpop.f32.mrf.mxu3  ;;  %v2002_v26 = vmax.f32 %v1970_v4, 0.0  ;;  %v1621_v47 = vadd.f32 %v1555_v63, %v1467_v22  ;;  %v1404_v7 = vpop.f32.mrf.mxu1 }
 0x253   : > { %v1468_v19 = vadd.f32 %v1404_v7, %v3411_v9 }
 0x254   : > { %v2033_v34 = vadd.f32 %v2032_v16, %v2002_v26  ;;  %v1779_v39 = vadd.f32 %v1713_v31, %v1621_v47 }
 0x255   : > { %v1873_v28 = vpop.f32.mrf.mxu0 }
 0x256   : > { %v1936_v11 = vadd.f32 %v1870_v21, %v1779_v39 }
 0x258   : > { %v1971_v45 = vadd.f32 %v3597_v23, %v1936_v11 }
 0x259   : > { %v1558_v2 = vpop.f32.mrf.mxu2 }
 0x25a   : > { %v1716_v29 = vpop.f32.mrf.mxu3  ;;  %v2003_v14 = vmax.f32 %v1971_v45, 0.0  ;;  %v1622_v17 = vadd.f32 %v1558_v2, %v1468_v19  ;;  %v1407_v43 = vpop.f32.mrf.mxu1 }
 0x25b   : > { %v1469_v48 = vadd.f32 %v1407_v43, %v3422_v37 }
 0x25c   : > { %v2034_v51 = vadd.f32 %v2033_v34, %v2003_v14  ;;  %v1780_v46 = vadd.f32 %v1716_v29, %v1622_v17 }
 0x25d   : > { %v1876_v36 = vpop.f32.mrf.mxu0 }
 0x25e   : > { %v1937_v0 = vadd.f32 %v1873_v28, %v1780_v46 }
 0x260   : > { %v1972_v12 = vadd.f32 %v3597_v23, %v1937_v0 }
 0x261   : > { %v1561_v9 = vpop.f32.mrf.mxu2 }
 0x262   : > { %v1719_v60 = vpop.f32.mrf.mxu3  ;;  %v2004_v40 = vmax.f32 %v1972_v12, 0.0  ;;  %v1623_v38 = vadd.f32 %v1561_v9, %v1469_v48  ;;  %v1410_v10 = vpop.f32.mrf.mxu1 }
 0x263   : > { %v1470_v15 = vadd.f32 %v1410_v10, %v3433_v5 }
 0x264   : > { %v2035_v49 = vadd.f32 %v2034_v51, %v2004_v40  ;;  %v1781_v18 = vadd.f32 %v1719_v60, %v1623_v38 }
 0x265   : > { %v1879_v61 = vpop.f32.mrf.mxu0 }
 0x266   : > { %v1938_v1 = vadd.f32 %v1876_v36, %v1781_v18 }
 0x268   : > { %v1973_v55 = vadd.f32 %v3597_v23, %v1938_v1 }
 0x269   : > { %v1564_v37 = vpop.f32.mrf.mxu2 }
 0x26a   : > { %v1722_v41 = vpop.f32.mrf.mxu3  ;;  %v2005_v8 = vmax.f32 %v1973_v55, 0.0  ;;  %v1624_v13 = vadd.f32 %v1564_v37, %v1470_v15  ;;  %v1413_v32 = vpop.f32.mrf.mxu1 }
 0x26b   : > { %v1471_v50 = vadd.f32 %v1413_v32, %v3444_v52 }
 0x26c   : > { %v2036_v54 = vadd.f32 %v2035_v49, %v2005_v8  ;;  %v1782_v58 = vadd.f32 %v1722_v41, %v1624_v13 }
 0x26d   : > { %v1882_v22 = vpop.f32.mrf.mxu0 }
 0x26e   : > { %v1939_v24 = vadd.f32 %v1879_v61, %v1782_v58 }
 0x270   : > { %v1974_v16 = vadd.f32 %v3597_v23, %v1939_v24 }
 0x271   : > { %v1567_v5 = vpop.f32.mrf.mxu2 }
 0x272   : > { %v1725_v62 = vpop.f32.mrf.mxu3  ;;  %v2006_v21 = vmax.f32 %v1974_v16, 0.0  ;;  %v1625_v20 = vadd.f32 %v1567_v5, %v1471_v50  ;;  %v1416_v57 = vpop.f32.mrf.mxu1 }
 0x273   : > { %v1472_v4 = vadd.f32 %v1416_v57, %v3455_v33 }
 0x274   : > { %v2037_v63 = vadd.f32 %v2036_v54, %v2006_v21  ;;  %v1783_v31 = vadd.f32 %v1725_v62, %v1625_v20 }
 0x275   : > { %v1885_v26 = vpop.f32.mrf.mxu0 }
 0x276   : > { %v1940_v47 = vadd.f32 %v1882_v22, %v1783_v31 }
 0x278   : > { %v1975_v7 = vadd.f32 %v3597_v23, %v1940_v47 }
 0x279   : > { %v1570_v52 = vpop.f32.mrf.mxu2 }
 0x27a   : > { %v1728_v19 = vpop.f32.mrf.mxu3  ;;  %v2007_v34 = vmax.f32 %v1975_v7, 0.0  ;;  %v1626_v39 = vadd.f32 %v1570_v52, %v1472_v4  ;;  %v1419_v28 = vpop.f32.mrf.mxu1 }
 0x27b   : > { %v1473_v14 = vadd.f32 %v1419_v28, %v3466_v3 }
 0x27c   : > { %v2038_v11 = vadd.f32 %v2037_v63, %v2007_v34  ;;  %v1784_v45 = vadd.f32 %v1728_v19, %v1626_v39 }
 0x27d   : > { %v1888_v2 = vpop.f32.mrf.mxu0 }
 0x27e   : > { %v1941_v29 = vadd.f32 %v1885_v26, %v1784_v45 }
 0x280   : > { %v1976_v17 = vadd.f32 %v3597_v23, %v1941_v29 }
 0x281   : > { %v1573_v33 = vpop.f32.mrf.mxu2 }
 0x282   : > { %v1731_v43 = vpop.f32.mrf.mxu3  ;;  %v2008_v48 = vmax.f32 %v1976_v17, 0.0  ;;  %v1627_v51 = vadd.f32 %v1573_v33, %v1473_v14  ;;  %v1422_v46 = vpop.f32.mrf.mxu1 }
 0x283   : > { %v1474_v60 = vadd.f32 %v1422_v46, %v3477_v56 }
 0x284   : > { %v2039_v36 = vadd.f32 %v2038_v11, %v2008_v48  ;;  %v1785_v0 = vadd.f32 %v1731_v43, %v1627_v51 }
 0x285   : > { %v1891_v12 = vpop.f32.mrf.mxu0 }
 0x286   : > { %v1942_v9 = vadd.f32 %v1888_v2, %v1785_v0 }
 0x288   : > { %v1977_v40 = vadd.f32 %v3597_v23, %v1942_v9 }
 0x289   : > { %v1576_v38 = vpop.f32.mrf.mxu2 }
 0x28a   : > { %v1734_v10 = vpop.f32.mrf.mxu3  ;;  %v2009_v15 = vmax.f32 %v1977_v40, 0.0  ;;  %v1628_v49 = vadd.f32 %v1576_v38, %v1474_v60  ;;  %v1425_v3 = vpop.f32.mrf.mxu1 }
 0x28b   : > { %v1475_v37 = vadd.f32 %v1425_v3, %v3488_v25 }
 0x28c   : > { %v2040_v18 = vadd.f32 %v2039_v36, %v2009_v15  ;;  %v1786_v61 = vadd.f32 %v1734_v10, %v1628_v49 }
 0x28d   : > { %v1894_v1 = vpop.f32.mrf.mxu0 }
 0x28e   : > { %v1943_v55 = vadd.f32 %v1891_v12, %v1786_v61 }
 0x290   : > { %v1978_v41 = vadd.f32 %v3597_v23, %v1943_v55 }
 0x291   : > { %v1579_v8 = vpop.f32.mrf.mxu2 }
 0x292   : > { %v1737_v13 = vpop.f32.mrf.mxu3  ;;  %v2010_v32 = vmax.f32 %v1978_v41, 0.0  ;;  %v1629_v50 = vadd.f32 %v1579_v8, %v1475_v37  ;;  %v1428_v56 = vpop.f32.mrf.mxu1 }
 0x293   : > { %v1476_v16 = vadd.f32 %v1428_v56, %v3499_v44 }
 0x294   : > { %v2041_v54 = vadd.f32 %v2040_v18, %v2010_v32  ;;  %v1787_v58 = vadd.f32 %v1737_v13, %v1629_v50 }
 0x295   : > { %v1897_v22 = vpop.f32.mrf.mxu0 }
 0x296   : > { %v1944_v24 = vadd.f32 %v1894_v1, %v1787_v58 }
 0x298   : > { %v1979_v5 = vadd.f32 %v3597_v23, %v1944_v24 }
 0x299   : > { %v1582_v62 = vpop.f32.mrf.mxu2 }
 0x29a   : > { %v1740_v21 = vpop.f32.mrf.mxu3  ;;  %v2011_v20 = vmax.f32 %v1979_v5, 0.0  ;;  %v1630_v57 = vadd.f32 %v1582_v62, %v1476_v16  ;;  %v1431_v25 = vpop.f32.mrf.mxu1 }
 0x29b   : > { %v1477_v47 = vadd.f32 %v1431_v25, %v3510_v35 }
 0x29c   : > { %v2042_v4 = vadd.f32 %v2041_v54, %v2011_v20  ;;  %v1788_v63 = vadd.f32 %v1740_v21, %v1630_v57 }
 0x29d   : > { %v1900_v31 = vpop.f32.mrf.mxu0 }
 0x29e   : > { %v1945_v26 = vadd.f32 %v1897_v22, %v1788_v63 }
 0x2a0   : > { %v1980_v7 = vadd.f32 %v3597_v23, %v1945_v26 }
 0x2a1   : > { %v1585_v52 = vpop.f32.mrf.mxu2 }
 0x2a2   : > { %v1743_v19 = vpop.f32.mrf.mxu3  ;;  %v2012_v34 = vmax.f32 %v1980_v7, 0.0  ;;  %v1631_v39 = vadd.f32 %v1585_v52, %v1477_v47  ;;  %v1434_v44 = vpop.f32.mrf.mxu1 }
 0x2a3   : > { %v1478_v29 = vadd.f32 %v1434_v44, %v3521_v53 }
 0x2a4   : > { %v2043_v28 = vadd.f32 %v2042_v4, %v2012_v34  ;;  %v1789_v11 = vadd.f32 %v1743_v19, %v1631_v39 }
 0x2a5   : > { %v1903_v45 = vpop.f32.mrf.mxu0 }
 0x2a6   : > { %v1946_v2 = vadd.f32 %v1900_v31, %v1789_v11 }
 0x2a8   : > { %v1981_v14 = vadd.f32 %v3597_v23, %v1946_v2 }
 0x2a9   : > { %v1588_v17 = vpop.f32.mrf.mxu2 }
 0x2aa   : > { %v1746_v33 = vpop.f32.mrf.mxu3  ;;  %v2013_v43 = vmax.f32 %v1981_v14, 0.0  ;;  %v1632_v48 = vadd.f32 %v1588_v17, %v1478_v29  ;;  %v1437_v35 = vpop.f32.mrf.mxu1 }
 0x2ab   : > { %v1479_v12 = vadd.f32 %v1437_v35, %v3532_v42 }
 0x2ac   : > { %v2044_v51 = vadd.f32 %v2043_v28, %v2013_v43  ;;  %v1790_v46 = vadd.f32 %v1746_v33, %v1632_v48 }
 0x2ad   : > { %v1906_v36 = vpop.f32.mrf.mxu0 }
 0x2ae   : > { %v1947_v0 = vadd.f32 %v1903_v45, %v1790_v46 }
 0x2b0   : > { %v1982_v9 = vadd.f32 %v3597_v23, %v1947_v0 }
 0x2b1   : > { %v1591_v60 = vpop.f32.mrf.mxu2 }
 0x2b2   : > { %v1749_v40 = vpop.f32.mrf.mxu3  ;;  %v2014_v38 = vmax.f32 %v1982_v9, 0.0  ;;  %v1633_v10 = vadd.f32 %v1591_v60, %v1479_v12  ;;  %v1440_v53 = vpop.f32.mrf.mxu1 }
 0x2b3   : > { %v1480_v61 = vadd.f32 %v1440_v53, %v3543_v30 }
 0x2b4   : > { %v2045_v15 = vadd.f32 %v2044_v51, %v2014_v38  ;;  %v1791_v49 = vadd.f32 %v1749_v40, %v1633_v10 }
 0x2b5   : > { %v1909_v3 = vpop.f32.mrf.mxu0 }
 0x2b6   : > { %v1948_v18 = vadd.f32 %v1906_v36, %v1791_v49 }
 0x2b8   : > { %v1983_v1 = vadd.f32 %v3597_v23, %v1948_v18 }
 0x2b9   : > { %v1594_v55 = vpop.f32.mrf.mxu2 }
 0x2ba   : > { %v1752_v37 = vpop.f32.mrf.mxu3  ;;  %v2015_v41 = vmax.f32 %v1983_v1, 0.0  ;;  %v1634_v8 = vadd.f32 %v1594_v55, %v1480_v61  ;;  %v1443_v42 = vpop.f32.mrf.mxu1 }
 0x2bb   : > { %v1481_v54 = vadd.f32 %v1443_v42, %v3554_v59 }
 0x2bc   : > { %v2046_v13 = vadd.f32 %v2045_v15, %v2015_v41  ;;  %v1792_v32 = vadd.f32 %v1752_v37, %v1634_v8 }
 0x2bd   : > { %v1912_v56 = vpop.f32.mrf.mxu0 }
 0x2be   : > { %v1949_v50 = vadd.f32 %v1909_v3, %v1792_v32 }
 0x2c0   : > { %v1984_v58 = vadd.f32 %v3597_v23, %v1949_v50 }
 0x2c1   : > { %v1597_v22 = vpop.f32.mrf.mxu2 }
 0x2c2   : > { %v1755_v24 = vpop.f32.mrf.mxu3  ;;  %v2016_v16 = vmax.f32 %v1984_v58, 0.0  ;;  %v1635_v5 = vadd.f32 %v1597_v22, %v1481_v54  ;;  %v1446_v30 = vpop.f32.mrf.mxu1 }
 0x2c3   : > { %v1482_v57 = vadd.f32 %v1446_v30, %v3565_v6 }
 0x2c4   : > { %v2047_v62 = vadd.f32 %v2046_v13, %v2016_v16  ;;  %v1793_v21 = vadd.f32 %v1755_v24, %v1635_v5 }
 0x2c5   : > { %v1915_v4 = vpop.f32.mrf.mxu0 }
 0x2c6   : > { %v1950_v20 = vadd.f32 %v1912_v56, %v1793_v21 }
 0x2c8   : > { %v1985_v25 = vadd.f32 %v3597_v23, %v1950_v20 }
 0x2c9   : > { %v1600_v63 = vpop.f32.mrf.mxu2 }
 0x2ca   : > { %v1758_v31 = vpop.f32.mrf.mxu3  ;;  %v2017_v26 = vmax.f32 %v1985_v25, 0.0  ;;  %v1636_v47 = vadd.f32 %v1600_v63, %v1482_v57  ;;  %v1449_v52 = vpop.f32.mrf.mxu1 }
 0x2cb   : > { %v1483_v34 = vadd.f32 %v1449_v52, %v3576_v27 }
 0x2cc   : > { %v2048_v59 = vadd.f32 %v2047_v62, %v2017_v26  ;;  %v1794_v7 = vadd.f32 %v1758_v31, %v1636_v47 }
 0x2cd   : > { %v1918_v45 = vpop.f32.mrf.mxu0 }
 0x2ce   : > { %v1951_v19 = vadd.f32 %v1915_v4, %v1794_v7 }
 0x2d0   : > { %v1986_v39 = vadd.f32 %v3597_v23, %v1951_v19 }
 0x2d1   : > { %v1603_v44 = vpop.f32.mrf.mxu2 }
 0x2d2   : > { %v1761_v28 = vpop.f32.mrf.mxu3  ;;  %v2018_v11 = vmax.f32 %v1986_v39, 0.0  ;;  %v1637_v6 = vadd.f32 %v1603_v44, %v1483_v34 }
 0x2d4   : > { %v2049_v2 = vadd.f32 %v2048_v59, %v2018_v11  ;;  %v1795_v29 = vadd.f32 %v1761_v28, %v1637_v6 }
 0x2d6   : > { %v1952_v14 = vadd.f32 %v1918_v45, %v1795_v29 }
 0x2d8   : > { %v1987_v17 = vadd.f32 %v3597_v23, %v1952_v14 }
 0x2da   : > { %v2019_v33 = vmax.f32 %v1987_v17, 0.0 }
 0x2dc   : > { %v2050_v43 = vadd.f32 %v2049_v2, %v2019_v33 }
 0x2de   : > { %v2051_v48 = vrot.slane %v2050_v43, 4 }
 0x2e0   : > { %v2052_v35 = vadd.f32 %v2051_v48, %v2050_v43 }
 0x2e2   : > { %v2053_v51 = vrot.slane %v2052_v35, 2 }
 0x2e4   : > { %v2054_v46 = vadd.f32 %v2053_v51, %v2052_v35 }
 0x2e6   : > { %v2055_v27 = vrot.slane %v2054_v46, 1 }
 0x2e8   : > { %v2056_v36 = vadd.f32 %v2055_v27, %v2054_v46 }
 0x2ea   : > { %2057 = vst [vmem:[%s166_s15] sm:$0x1] %v2056_v36 }
 0x2eb PF: > { %s13_s12 = sadd.s32 1, %s2453_s12  }
 0x2ec   : > { %p10_p4 = scmp.ge.s32.totalorder %s13_s12, 4  }
 0x2ee   :  { %12 = sbr.rel (!%p10_p4) target bundleno = 1 (0x1), region = 62 }

</bundles_post_ra>
